<compile_context>
chip_gen: v6e
topology: v6e:2x2x1
jax: 0.10.0
libtpu: 0.0.40
codegen_flags: <defaults>
</compile_context>

<pallas_src>
import jax
import jax.numpy as jnp
from jax import lax
from jax.experimental import pallas as pl
from jax.experimental.pallas import tpu as pltpu


def _mxu_dot(a, b):
    # Single-pass MXU matmul with f32 accumulation (explicit per perf review).
    return jnp.dot(a, b, precision=lax.Precision.DEFAULT,
                   preferred_element_type=jnp.float32)


def _make_caption_lstm_kernel(T, Bp):
    def kernel(tok_ref, table_ref, wih0_ref, whh0_ref, b0_ref,
               wih1_ref, whh1_ref, b1_ref, fcw_ref, fcb_ref, out_ref):
        H = whh0_ref.shape[0]
        H4 = 4 * H
        TB = tok_ref.shape[0]            # T * Bp
        Vp = table_ref.shape[0]

        # ---- Fused embedding gather (one-hot selection matmul) + hoisted
        # layer-0 input projection; both sit off the serial recurrence.
        tok = tok_ref[...]                                          # (TB, 1) int32
        vocab_ids = lax.broadcasted_iota(jnp.int32, (TB, Vp), 1)
        onehot = (tok == vocab_ids).astype(jnp.float32)             # (TB, Vp)
        emb = _mxu_dot(onehot, table_ref[...])                      # (TB, E)
        xproj = _mxu_dot(emb, wih0_ref[...]) + b0_ref[...]          # (TB, 4H)

        # ---- Loop invariants hoisted once (no per-step broadcast/load).
        whh0 = whh0_ref[...]                                        # (H, 4H)
        wih1 = wih1_ref[...]                                        # (H, 4H)
        whh1 = whh1_ref[...]                                        # (H, 4H)
        b1b = jnp.broadcast_to(b1_ref[...], (Bp, H4))               # (Bp, 4H)
        lane = lax.broadcasted_iota(jnp.int32, (Bp, H4), 1)
        tanh_lanes = (lane >= 2 * H) & (lane < 3 * H)               # g-gate lanes

        def gates_to_hc(gates, c):
            # Two full-vreg EUP passes + one lane-mask blend instead of four
            # sliced 32-lane transcendentals. Gate order: i, f, g, o.
            sg = jax.nn.sigmoid(gates)
            tg = jnp.tanh(gates)
            acts = jnp.where(tanh_lanes, tg, sg)
            i_g = acts[:, 0:H]
            f_g = acts[:, H:2 * H]
            g_g = acts[:, 2 * H:3 * H]
            o_g = acts[:, 3 * H:4 * H]
            c_new = f_g * c + i_g * g_g
            h_new = o_g * jnp.tanh(c_new)
            return h_new, c_new

        zeros = jnp.zeros((Bp, H), jnp.float32)
        h0, c0, h1, c1 = zeros, zeros, zeros, zeros

        # ---- Skewed, fully-unrolled recurrence: iteration t runs layer 0 at
        # step t and layer 1 at step t-1, so the matmuls inside one iteration
        # are independent. Exact-zero matmuls of the first steps are skipped.
        for t in range(T + 1):
            h0_prev = h0                       # layer-0 hidden from step t-1
            if t < T:
                g0 = xproj[t * Bp:(t + 1) * Bp, :]
                if t > 0:
                    g0 = g0 + _mxu_dot(h0_prev, whh0)
            if t >= 1:
                g1 = _mxu_dot(h0_prev, wih1) + b1b
                if t > 1:
                    g1 = g1 + _mxu_dot(h1, whh1)
            if t < T:
                h0, c0 = gates_to_hc(g0, c0)
            if t >= 1:
                h1, c1 = gates_to_hc(g1, c1)

        # ---- fc(hidden[-1])
        out_ref[...] = _mxu_dot(h1, fcw_ref[...]) + fcb_ref[...]

    return kernel


def caption_lstm_forward(tokens, params):
    B, T = tokens.shape
    V, _E = params["embedding"].shape
    H = params["whh0"].shape[0]
    C = params["fcw"].shape[1]

    # Pad batch to the f32 sublane count (8) so per-step slices of the hoisted
    # projection stay (8,128)-tile aligned, and pad vocab to a lane-friendly
    # multiple of 64 for the one-hot selection matmul. This is tiny
    # wrapper-side layout plumbing; the embedded tensor never leaves the kernel.
    Bp = max(8, ((B + 7) // 8) * 8)
    Vp = ((V + 63) // 64) * 64

    tokens_p = jnp.pad(tokens, ((0, Bp - B), (0, 0)))
    tok_tm = tokens_p.T.reshape(T * Bp, 1).astype(jnp.int32)   # time-major column
    table_p = jnp.pad(params["embedding"].astype(jnp.float32),
                      ((0, Vp - V), (0, 0)))

    vmem = pl.BlockSpec(memory_space=pltpu.MemorySpace.VMEM)
    out_p = pl.pallas_call(
        _make_caption_lstm_kernel(T, Bp),
        out_shape=jax.ShapeDtypeStruct((Bp, C), jnp.float32),
        in_specs=[vmem] * 10,
        out_specs=vmem,
    )(tok_tm, table_p, params["wih0"], params["whh0"], params["b0"],
      params["wih1"], params["whh1"], params["b1"],
      params["fcw"], params["fcb"])
    return out_p[:B]


def reference_forward(tokens, params):
    # Pure-JAX reference mirroring torch semantics (i, f, g, o gates).
    emb = jnp.take(params["embedding"], tokens, axis=0)          # (B, T, E)
    B, T, _ = emb.shape
    H = params["whh0"].shape[0]

    def layer(xs, wih, whh, b):
        def step(carry, x_t):
            h, c = carry
            g = x_t @ wih + h @ whh + b
            i_g = jax.nn.sigmoid(g[:, 0:H])
            f_g = jax.nn.sigmoid(g[:, H:2 * H])
            g_g = jnp.tanh(g[:, 2 * H:3 * H])
            o_g = jax.nn.sigmoid(g[:, 3 * H:4 * H])
            c_new = f_g * c + i_g * g_g
            h_new = o_g * jnp.tanh(c_new)
            return (h_new, c_new), h_new

        init = (jnp.zeros((B, H), jnp.float32), jnp.zeros((B, H), jnp.float32))
        (h_last, _), hs = lax.scan(step, init, jnp.transpose(xs, (1, 0, 2)))
        return jnp.transpose(hs, (1, 0, 2)), h_last

    h0_seq, _ = layer(emb, params["wih0"], params["whh0"], params["b0"])
    _, h1 = layer(h0_seq, params["wih1"], params["whh1"], params["b1"])
    return h1 @ params["fcw"] + params["fcb"]


def init_params(key, vocab_size, embed_dim, hidden_dim):
    ks = jax.random.split(key, 9)
    s = 0.1
    H4 = 4 * hidden_dim
    return {
        "embedding": s * jax.random.normal(ks[0], (vocab_size, embed_dim), jnp.float32),
        "wih0": s * jax.random.normal(ks[1], (embed_dim, H4), jnp.float32),
        "whh0": s * jax.random.normal(ks[2], (hidden_dim, H4), jnp.float32),
        "b0": s * jax.random.normal(ks[3], (1, H4), jnp.float32),
        "wih1": s * jax.random.normal(ks[4], (hidden_dim, H4), jnp.float32),
        "whh1": s * jax.random.normal(ks[5], (hidden_dim, H4), jnp.float32),
        "b1": s * jax.random.normal(ks[6], (1, H4), jnp.float32),
        "fcw": s * jax.random.normal(ks[7], (hidden_dim, 256), jnp.float32),
        "fcb": s * jax.random.normal(ks[8], (1, 256), jnp.float32),
    }


if __name__ == "__main__":
    vocab_size, embed_dim, hidden_dim, num_layers = 50, 32, 32, 2
    batch, seq = 2, 8
    assert num_layers == 2  # kernel implements the spec's 2-layer LSTM

    key = jax.random.PRNGKey(0)
    kp, kt = jax.random.split(key)
    params = init_params(kp, vocab_size, embed_dim, hidden_dim)
    tokens = jax.random.randint(kt, (batch, seq), 0, vocab_size, dtype=jnp.int32)

    fwd = jax.jit(caption_lstm_forward)
    out = jax.block_until_ready(fwd(tokens, params))

    ref = reference_forward(tokens, params)
    assert out.shape == (batch, 256)
    # atol headroom covers single-pass MXU rounding vs. the XLA-compiled
    # reference; any semantic bug would be orders of magnitude larger.
    assert jnp.allclose(out, ref, rtol=1e-4, atol=5e-4), "mismatch vs reference"

    print("KERNEL_OK")
</pallas_src>

<mosaic_0001>
module attributes {stable_mosaic.version = 11 : i64} {
  func.func @kernel(%arg0: memref<64x1xi32, #tpu.memory_space<vmem>>, %arg1: memref<64x32xf32, #tpu.memory_space<vmem>>, %arg2: memref<32x128xf32, #tpu.memory_space<vmem>>, %arg3: memref<32x128xf32, #tpu.memory_space<vmem>>, %arg4: memref<1x128xf32, #tpu.memory_space<vmem>>, %arg5: memref<32x128xf32, #tpu.memory_space<vmem>>, %arg6: memref<32x128xf32, #tpu.memory_space<vmem>>, %arg7: memref<1x128xf32, #tpu.memory_space<vmem>>, %arg8: memref<32x256xf32, #tpu.memory_space<vmem>>, %arg9: memref<1x256xf32, #tpu.memory_space<vmem>>, %arg10: memref<8x256xf32, #tpu.memory_space<vmem>>) attributes {dimension_semantics = [], scalar_prefetch = 0 : i64, scratch_operands = 0 : i64, tpu.core_type = #tpu.core_type<tc>} {
    %c0 = arith.constant 0 : index
    %c0_0 = arith.constant 0 : index
    %0 = vector.load %arg0[%c0, %c0_0] : memref<64x1xi32, #tpu.memory_space<vmem>>, vector<64x1xi32>
    %1 = tpu.iota {dimensions = array<i32: 1>} : vector<64x64xi32>
    %2 = vector.broadcast %0 : vector<64x1xi32> to vector<64x64xi32>
    %3 = arith.cmpi eq, %2, %1 : vector<64x64xi32>
    %4 = arith.extui %3 : vector<64x64xi1> to vector<64x64xi32>
    %5 = arith.sitofp %4 : vector<64x64xi32> to vector<64x64xf32>
    %c0_1 = arith.constant 0 : index
    %c0_2 = arith.constant 0 : index
    %6 = vector.load %arg1[%c0_1, %c0_2] : memref<64x32xf32, #tpu.memory_space<vmem>>, vector<64x32xf32>
    %cst = arith.constant dense<0.000000e+00> : vector<64x32xf32>
    %7 = tpu.matmul %5, %6, %cst {dimension_numbers = #tpu.dot_dimension_numbers<[1], [0], [0], [1], [0, 0, 1, 1], [], []>} : vector<64x64xf32>, vector<64x32xf32>, vector<64x32xf32> -> vector<64x32xf32>
    %c0_3 = arith.constant 0 : index
    %c0_4 = arith.constant 0 : index
    %8 = vector.load %arg2[%c0_3, %c0_4] : memref<32x128xf32, #tpu.memory_space<vmem>>, vector<32x128xf32>
    %cst_5 = arith.constant dense<0.000000e+00> : vector<64x128xf32>
    %9 = tpu.matmul %7, %8, %cst_5 {dimension_numbers = #tpu.dot_dimension_numbers<[1], [0], [0], [1], [0, 0, 1, 1], [], []>} : vector<64x32xf32>, vector<32x128xf32>, vector<64x128xf32> -> vector<64x128xf32>
    %c0_6 = arith.constant 0 : index
    %c0_7 = arith.constant 0 : index
    %10 = vector.load %arg4[%c0_6, %c0_7] : memref<1x128xf32, #tpu.memory_space<vmem>>, vector<1x128xf32>
    %11 = vector.broadcast %10 : vector<1x128xf32> to vector<64x128xf32>
    %12 = arith.addf %9, %11 : vector<64x128xf32>
    %c0_8 = arith.constant 0 : index
    %c0_9 = arith.constant 0 : index
    %13 = vector.load %arg3[%c0_8, %c0_9] : memref<32x128xf32, #tpu.memory_space<vmem>>, vector<32x128xf32>
    %c0_10 = arith.constant 0 : index
    %c0_11 = arith.constant 0 : index
    %14 = vector.load %arg5[%c0_10, %c0_11] : memref<32x128xf32, #tpu.memory_space<vmem>>, vector<32x128xf32>
    %c0_12 = arith.constant 0 : index
    %c0_13 = arith.constant 0 : index
    %15 = vector.load %arg6[%c0_12, %c0_13] : memref<32x128xf32, #tpu.memory_space<vmem>>, vector<32x128xf32>
    %c0_14 = arith.constant 0 : index
    %c0_15 = arith.constant 0 : index
    %16 = vector.load %arg7[%c0_14, %c0_15] : memref<1x128xf32, #tpu.memory_space<vmem>>, vector<1x128xf32>
    %17 = vector.shape_cast %16 : vector<1x128xf32> to vector<1x128xf32>
    %18 = vector.broadcast %17 : vector<1x128xf32> to vector<8x128xf32>
    %19 = tpu.iota {dimensions = array<i32: 1>} : vector<8x128xi32>
    %c64_i32 = arith.constant 64 : i32
    %20 = vector.broadcast %c64_i32 : i32 to vector<8x128xi32>
    %21 = arith.cmpi sge, %19, %20 : vector<8x128xi32>
    %c96_i32 = arith.constant 96 : i32
    %22 = vector.broadcast %c96_i32 : i32 to vector<8x128xi32>
    %23 = arith.cmpi slt, %19, %22 : vector<8x128xi32>
    %24 = arith.andi %21, %23 : vector<8x128xi1>
    %cst_16 = arith.constant 0.000000e+00 : f32
    %25 = vector.broadcast %cst_16 : f32 to vector<8x32xf32>
    %26 = vector.extract_strided_slice %12 {offsets = [0, 0], sizes = [8, 128], strides = [1, 1]} : vector<64x128xf32> to vector<8x128xf32>
    %27 = arith.negf %26 : vector<8x128xf32>
    %28 = math.exp %27 : vector<8x128xf32>
    %cst_17 = arith.constant 1.000000e+00 : f32
    %29 = vector.broadcast %cst_17 : f32 to vector<8x128xf32>
    %30 = arith.addf %29, %28 : vector<8x128xf32>
    %31 = arith.divf %29, %30 : vector<8x128xf32>
    %32 = math.tanh %26 : vector<8x128xf32>
    %33 = arith.select %24, %32, %31 : vector<8x128xi1>, vector<8x128xf32>
    %34 = vector.extract_strided_slice %33 {offsets = [0, 0], sizes = [8, 32], strides = [1, 1]} : vector<8x128xf32> to vector<8x32xf32>
    %35 = vector.extract_strided_slice %33 {offsets = [0, 32], sizes = [8, 32], strides = [1, 1]} : vector<8x128xf32> to vector<8x32xf32>
    %36 = vector.extract_strided_slice %33 {offsets = [0, 64], sizes = [8, 32], strides = [1, 1]} : vector<8x128xf32> to vector<8x32xf32>
    %37 = vector.extract_strided_slice %33 {offsets = [0, 96], sizes = [8, 32], strides = [1, 1]} : vector<8x128xf32> to vector<8x32xf32>
    %38 = arith.mulf %35, %25 : vector<8x32xf32>
    %39 = arith.mulf %34, %36 : vector<8x32xf32>
    %40 = arith.addf %38, %39 : vector<8x32xf32>
    %41 = math.tanh %40 : vector<8x32xf32>
    %42 = arith.mulf %37, %41 : vector<8x32xf32>
    %43 = vector.extract_strided_slice %12 {offsets = [8, 0], sizes = [8, 128], strides = [1, 1]} : vector<64x128xf32> to vector<8x128xf32>
    %cst_18 = arith.constant dense<0.000000e+00> : vector<8x128xf32>
    %44 = tpu.matmul %42, %13, %cst_18 {dimension_numbers = #tpu.dot_dimension_numbers<[1], [0], [0], [1], [0, 0, 1, 1], [], []>} : vector<8x32xf32>, vector<32x128xf32>, vector<8x128xf32> -> vector<8x128xf32>
    %45 = arith.addf %43, %44 : vector<8x128xf32>
    %cst_19 = arith.constant dense<0.000000e+00> : vector<8x128xf32>
    %46 = tpu.matmul %42, %14, %cst_19 {dimension_numbers = #tpu.dot_dimension_numbers<[1], [0], [0], [1], [0, 0, 1, 1], [], []>} : vector<8x32xf32>, vector<32x128xf32>, vector<8x128xf32> -> vector<8x128xf32>
    %47 = arith.addf %46, %18 : vector<8x128xf32>
    %48 = arith.negf %45 : vector<8x128xf32>
    %49 = math.exp %48 : vector<8x128xf32>
    %cst_20 = arith.constant 1.000000e+00 : f32
    %50 = vector.broadcast %cst_20 : f32 to vector<8x128xf32>
    %51 = arith.addf %50, %49 : vector<8x128xf32>
    %52 = arith.divf %50, %51 : vector<8x128xf32>
    %53 = math.tanh %45 : vector<8x128xf32>
    %54 = arith.select %24, %53, %52 : vector<8x128xi1>, vector<8x128xf32>
    %55 = vector.extract_strided_slice %54 {offsets = [0, 0], sizes = [8, 32], strides = [1, 1]} : vector<8x128xf32> to vector<8x32xf32>
    %56 = vector.extract_strided_slice %54 {offsets = [0, 32], sizes = [8, 32], strides = [1, 1]} : vector<8x128xf32> to vector<8x32xf32>
    %57 = vector.extract_strided_slice %54 {offsets = [0, 64], sizes = [8, 32], strides = [1, 1]} : vector<8x128xf32> to vector<8x32xf32>
    %58 = vector.extract_strided_slice %54 {offsets = [0, 96], sizes = [8, 32], strides = [1, 1]} : vector<8x128xf32> to vector<8x32xf32>
    %59 = arith.mulf %56, %40 : vector<8x32xf32>
    %60 = arith.mulf %55, %57 : vector<8x32xf32>
    %61 = arith.addf %59, %60 : vector<8x32xf32>
    %62 = math.tanh %61 : vector<8x32xf32>
    %63 = arith.mulf %58, %62 : vector<8x32xf32>
    %64 = arith.negf %47 : vector<8x128xf32>
    %65 = math.exp %64 : vector<8x128xf32>
    %cst_21 = arith.constant 1.000000e+00 : f32
    %66 = vector.broadcast %cst_21 : f32 to vector<8x128xf32>
    %67 = arith.addf %66, %65 : vector<8x128xf32>
    %68 = arith.divf %66, %67 : vector<8x128xf32>
    %69 = math.tanh %47 : vector<8x128xf32>
    %70 = arith.select %24, %69, %68 : vector<8x128xi1>, vector<8x128xf32>
    %71 = vector.extract_strided_slice %70 {offsets = [0, 0], sizes = [8, 32], strides = [1, 1]} : vector<8x128xf32> to vector<8x32xf32>
    %72 = vector.extract_strided_slice %70 {offsets = [0, 32], sizes = [8, 32], strides = [1, 1]} : vector<8x128xf32> to vector<8x32xf32>
    %73 = vector.extract_strided_slice %70 {offsets = [0, 64], sizes = [8, 32], strides = [1, 1]} : vector<8x128xf32> to vector<8x32xf32>
    %74 = vector.extract_strided_slice %70 {offsets = [0, 96], sizes = [8, 32], strides = [1, 1]} : vector<8x128xf32> to vector<8x32xf32>
    %75 = arith.mulf %72, %25 : vector<8x32xf32>
    %76 = arith.mulf %71, %73 : vector<8x32xf32>
    %77 = arith.addf %75, %76 : vector<8x32xf32>
    %78 = math.tanh %77 : vector<8x32xf32>
    %79 = arith.mulf %74, %78 : vector<8x32xf32>
    %80 = vector.extract_strided_slice %12 {offsets = [16, 0], sizes = [8, 128], strides = [1, 1]} : vector<64x128xf32> to vector<8x128xf32>
    %cst_22 = arith.constant dense<0.000000e+00> : vector<8x128xf32>
    %81 = tpu.matmul %63, %13, %cst_22 {dimension_numbers = #tpu.dot_dimension_numbers<[1], [0], [0], [1], [0, 0, 1, 1], [], []>} : vector<8x32xf32>, vector<32x128xf32>, vector<8x128xf32> -> vector<8x128xf32>
    %82 = arith.addf %80, %81 : vector<8x128xf32>
    %cst_23 = arith.constant dense<0.000000e+00> : vector<8x128xf32>
    %83 = tpu.matmul %63, %14, %cst_23 {dimension_numbers = #tpu.dot_dimension_numbers<[1], [0], [0], [1], [0, 0, 1, 1], [], []>} : vector<8x32xf32>, vector<32x128xf32>, vector<8x128xf32> -> vector<8x128xf32>
    %84 = arith.addf %83, %18 : vector<8x128xf32>
    %cst_24 = arith.constant dense<0.000000e+00> : vector<8x128xf32>
    %85 = tpu.matmul %79, %15, %cst_24 {dimension_numbers = #tpu.dot_dimension_numbers<[1], [0], [0], [1], [0, 0, 1, 1], [], []>} : vector<8x32xf32>, vector<32x128xf32>, vector<8x128xf32> -> vector<8x128xf32>
    %86 = arith.addf %84, %85 : vector<8x128xf32>
    %87 = arith.negf %82 : vector<8x128xf32>
    %88 = math.exp %87 : vector<8x128xf32>
    %cst_25 = arith.constant 1.000000e+00 : f32
    %89 = vector.broadcast %cst_25 : f32 to vector<8x128xf32>
    %90 = arith.addf %89, %88 : vector<8x128xf32>
    %91 = arith.divf %89, %90 : vector<8x128xf32>
    %92 = math.tanh %82 : vector<8x128xf32>
    %93 = arith.select %24, %92, %91 : vector<8x128xi1>, vector<8x128xf32>
    %94 = vector.extract_strided_slice %93 {offsets = [0, 0], sizes = [8, 32], strides = [1, 1]} : vector<8x128xf32> to vector<8x32xf32>
    %95 = vector.extract_strided_slice %93 {offsets = [0, 32], sizes = [8, 32], strides = [1, 1]} : vector<8x128xf32> to vector<8x32xf32>
    %96 = vector.extract_strided_slice %93 {offsets = [0, 64], sizes = [8, 32], strides = [1, 1]} : vector<8x128xf32> to vector<8x32xf32>
    %97 = vector.extract_strided_slice %93 {offsets = [0, 96], sizes = [8, 32], strides = [1, 1]} : vector<8x128xf32> to vector<8x32xf32>
    %98 = arith.mulf %95, %61 : vector<8x32xf32>
    %99 = arith.mulf %94, %96 : vector<8x32xf32>
    %100 = arith.addf %98, %99 : vector<8x32xf32>
    %101 = math.tanh %100 : vector<8x32xf32>
    %102 = arith.mulf %97, %101 : vector<8x32xf32>
    %103 = arith.negf %86 : vector<8x128xf32>
    %104 = math.exp %103 : vector<8x128xf32>
    %cst_26 = arith.constant 1.000000e+00 : f32
    %105 = vector.broadcast %cst_26 : f32 to vector<8x128xf32>
    %106 = arith.addf %105, %104 : vector<8x128xf32>
    %107 = arith.divf %105, %106 : vector<8x128xf32>
    %108 = math.tanh %86 : vector<8x128xf32>
    %109 = arith.select %24, %108, %107 : vector<8x128xi1>, vector<8x128xf32>
    %110 = vector.extract_strided_slice %109 {offsets = [0, 0], sizes = [8, 32], strides = [1, 1]} : vector<8x128xf32> to vector<8x32xf32>
    %111 = vector.extract_strided_slice %109 {offsets = [0, 32], sizes = [8, 32], strides = [1, 1]} : vector<8x128xf32> to vector<8x32xf32>
    %112 = vector.extract_strided_slice %109 {offsets = [0, 64], sizes = [8, 32], strides = [1, 1]} : vector<8x128xf32> to vector<8x32xf32>
    %113 = vector.extract_strided_slice %109 {offsets = [0, 96], sizes = [8, 32], strides = [1, 1]} : vector<8x128xf32> to vector<8x32xf32>
    %114 = arith.mulf %111, %77 : vector<8x32xf32>
    %115 = arith.mulf %110, %112 : vector<8x32xf32>
    %116 = arith.addf %114, %115 : vector<8x32xf32>
    %117 = math.tanh %116 : vector<8x32xf32>
    %118 = arith.mulf %113, %117 : vector<8x32xf32>
    %119 = vector.extract_strided_slice %12 {offsets = [24, 0], sizes = [8, 128], strides = [1, 1]} : vector<64x128xf32> to vector<8x128xf32>
    %cst_27 = arith.constant dense<0.000000e+00> : vector<8x128xf32>
    %120 = tpu.matmul %102, %13, %cst_27 {dimension_numbers = #tpu.dot_dimension_numbers<[1], [0], [0], [1], [0, 0, 1, 1], [], []>} : vector<8x32xf32>, vector<32x128xf32>, vector<8x128xf32> -> vector<8x128xf32>
    %121 = arith.addf %119, %120 : vector<8x128xf32>
    %cst_28 = arith.constant dense<0.000000e+00> : vector<8x128xf32>
    %122 = tpu.matmul %102, %14, %cst_28 {dimension_numbers = #tpu.dot_dimension_numbers<[1], [0], [0], [1], [0, 0, 1, 1], [], []>} : vector<8x32xf32>, vector<32x128xf32>, vector<8x128xf32> -> vector<8x128xf32>
    %123 = arith.addf %122, %18 : vector<8x128xf32>
    %cst_29 = arith.constant dense<0.000000e+00> : vector<8x128xf32>
    %124 = tpu.matmul %118, %15, %cst_29 {dimension_numbers = #tpu.dot_dimension_numbers<[1], [0], [0], [1], [0, 0, 1, 1], [], []>} : vector<8x32xf32>, vector<32x128xf32>, vector<8x128xf32> -> vector<8x128xf32>
    %125 = arith.addf %123, %124 : vector<8x128xf32>
    %126 = arith.negf %121 : vector<8x128xf32>
    %127 = math.exp %126 : vector<8x128xf32>
    %cst_30 = arith.constant 1.000000e+00 : f32
    %128 = vector.broadcast %cst_30 : f32 to vector<8x128xf32>
    %129 = arith.addf %128, %127 : vector<8x128xf32>
    %130 = arith.divf %128, %129 : vector<8x128xf32>
    %131 = math.tanh %121 : vector<8x128xf32>
    %132 = arith.select %24, %131, %130 : vector<8x128xi1>, vector<8x128xf32>
    %133 = vector.extract_strided_slice %132 {offsets = [0, 0], sizes = [8, 32], strides = [1, 1]} : vector<8x128xf32> to vector<8x32xf32>
    %134 = vector.extract_strided_slice %132 {offsets = [0, 32], sizes = [8, 32], strides = [1, 1]} : vector<8x128xf32> to vector<8x32xf32>
    %135 = vector.extract_strided_slice %132 {offsets = [0, 64], sizes = [8, 32], strides = [1, 1]} : vector<8x128xf32> to vector<8x32xf32>
    %136 = vector.extract_strided_slice %132 {offsets = [0, 96], sizes = [8, 32], strides = [1, 1]} : vector<8x128xf32> to vector<8x32xf32>
    %137 = arith.mulf %134, %100 : vector<8x32xf32>
    %138 = arith.mulf %133, %135 : vector<8x32xf32>
    %139 = arith.addf %137, %138 : vector<8x32xf32>
    %140 = math.tanh %139 : vector<8x32xf32>
    %141 = arith.mulf %136, %140 : vector<8x32xf32>
    %142 = arith.negf %125 : vector<8x128xf32>
    %143 = math.exp %142 : vector<8x128xf32>
    %cst_31 = arith.constant 1.000000e+00 : f32
    %144 = vector.broadcast %cst_31 : f32 to vector<8x128xf32>
    %145 = arith.addf %144, %143 : vector<8x128xf32>
    %146 = arith.divf %144, %145 : vector<8x128xf32>
    %147 = math.tanh %125 : vector<8x128xf32>
    %148 = arith.select %24, %147, %146 : vector<8x128xi1>, vector<8x128xf32>
    %149 = vector.extract_strided_slice %148 {offsets = [0, 0], sizes = [8, 32], strides = [1, 1]} : vector<8x128xf32> to vector<8x32xf32>
    %150 = vector.extract_strided_slice %148 {offsets = [0, 32], sizes = [8, 32], strides = [1, 1]} : vector<8x128xf32> to vector<8x32xf32>
    %151 = vector.extract_strided_slice %148 {offsets = [0, 64], sizes = [8, 32], strides = [1, 1]} : vector<8x128xf32> to vector<8x32xf32>
    %152 = vector.extract_strided_slice %148 {offsets = [0, 96], sizes = [8, 32], strides = [1, 1]} : vector<8x128xf32> to vector<8x32xf32>
    %153 = arith.mulf %150, %116 : vector<8x32xf32>
    %154 = arith.mulf %149, %151 : vector<8x32xf32>
    %155 = arith.addf %153, %154 : vector<8x32xf32>
    %156 = math.tanh %155 : vector<8x32xf32>
    %157 = arith.mulf %152, %156 : vector<8x32xf32>
    %158 = vector.extract_strided_slice %12 {offsets = [32, 0], sizes = [8, 128], strides = [1, 1]} : vector<64x128xf32> to vector<8x128xf32>
    %cst_32 = arith.constant dense<0.000000e+00> : vector<8x128xf32>
    %159 = tpu.matmul %141, %13, %cst_32 {dimension_numbers = #tpu.dot_dimension_numbers<[1], [0], [0], [1], [0, 0, 1, 1], [], []>} : vector<8x32xf32>, vector<32x128xf32>, vector<8x128xf32> -> vector<8x128xf32>
    %160 = arith.addf %158, %159 : vector<8x128xf32>
    %cst_33 = arith.constant dense<0.000000e+00> : vector<8x128xf32>
    %161 = tpu.matmul %141, %14, %cst_33 {dimension_numbers = #tpu.dot_dimension_numbers<[1], [0], [0], [1], [0, 0, 1, 1], [], []>} : vector<8x32xf32>, vector<32x128xf32>, vector<8x128xf32> -> vector<8x128xf32>
    %162 = arith.addf %161, %18 : vector<8x128xf32>
    %cst_34 = arith.constant dense<0.000000e+00> : vector<8x128xf32>
    %163 = tpu.matmul %157, %15, %cst_34 {dimension_numbers = #tpu.dot_dimension_numbers<[1], [0], [0], [1], [0, 0, 1, 1], [], []>} : vector<8x32xf32>, vector<32x128xf32>, vector<8x128xf32> -> vector<8x128xf32>
    %164 = arith.addf %162, %163 : vector<8x128xf32>
    %165 = arith.negf %160 : vector<8x128xf32>
    %166 = math.exp %165 : vector<8x128xf32>
    %cst_35 = arith.constant 1.000000e+00 : f32
    %167 = vector.broadcast %cst_35 : f32 to vector<8x128xf32>
    %168 = arith.addf %167, %166 : vector<8x128xf32>
    %169 = arith.divf %167, %168 : vector<8x128xf32>
    %170 = math.tanh %160 : vector<8x128xf32>
    %171 = arith.select %24, %170, %169 : vector<8x128xi1>, vector<8x128xf32>
    %172 = vector.extract_strided_slice %171 {offsets = [0, 0], sizes = [8, 32], strides = [1, 1]} : vector<8x128xf32> to vector<8x32xf32>
    %173 = vector.extract_strided_slice %171 {offsets = [0, 32], sizes = [8, 32], strides = [1, 1]} : vector<8x128xf32> to vector<8x32xf32>
    %174 = vector.extract_strided_slice %171 {offsets = [0, 64], sizes = [8, 32], strides = [1, 1]} : vector<8x128xf32> to vector<8x32xf32>
    %175 = vector.extract_strided_slice %171 {offsets = [0, 96], sizes = [8, 32], strides = [1, 1]} : vector<8x128xf32> to vector<8x32xf32>
    %176 = arith.mulf %173, %139 : vector<8x32xf32>
    %177 = arith.mulf %172, %174 : vector<8x32xf32>
    %178 = arith.addf %176, %177 : vector<8x32xf32>
    %179 = math.tanh %178 : vector<8x32xf32>
    %180 = arith.mulf %175, %179 : vector<8x32xf32>
    %181 = arith.negf %164 : vector<8x128xf32>
    %182 = math.exp %181 : vector<8x128xf32>
    %cst_36 = arith.constant 1.000000e+00 : f32
    %183 = vector.broadcast %cst_36 : f32 to vector<8x128xf32>
    %184 = arith.addf %183, %182 : vector<8x128xf32>
    %185 = arith.divf %183, %184 : vector<8x128xf32>
    %186 = math.tanh %164 : vector<8x128xf32>
    %187 = arith.select %24, %186, %185 : vector<8x128xi1>, vector<8x128xf32>
    %188 = vector.extract_strided_slice %187 {offsets = [0, 0], sizes = [8, 32], strides = [1, 1]} : vector<8x128xf32> to vector<8x32xf32>
    %189 = vector.extract_strided_slice %187 {offsets = [0, 32], sizes = [8, 32], strides = [1, 1]} : vector<8x128xf32> to vector<8x32xf32>
    %190 = vector.extract_strided_slice %187 {offsets = [0, 64], sizes = [8, 32], strides = [1, 1]} : vector<8x128xf32> to vector<8x32xf32>
    %191 = vector.extract_strided_slice %187 {offsets = [0, 96], sizes = [8, 32], strides = [1, 1]} : vector<8x128xf32> to vector<8x32xf32>
    %192 = arith.mulf %189, %155 : vector<8x32xf32>
    %193 = arith.mulf %188, %190 : vector<8x32xf32>
    %194 = arith.addf %192, %193 : vector<8x32xf32>
    %195 = math.tanh %194 : vector<8x32xf32>
    %196 = arith.mulf %191, %195 : vector<8x32xf32>
    %197 = vector.extract_strided_slice %12 {offsets = [40, 0], sizes = [8, 128], strides = [1, 1]} : vector<64x128xf32> to vector<8x128xf32>
    %cst_37 = arith.constant dense<0.000000e+00> : vector<8x128xf32>
    %198 = tpu.matmul %180, %13, %cst_37 {dimension_numbers = #tpu.dot_dimension_numbers<[1], [0], [0], [1], [0, 0, 1, 1], [], []>} : vector<8x32xf32>, vector<32x128xf32>, vector<8x128xf32> -> vector<8x128xf32>
    %199 = arith.addf %197, %198 : vector<8x128xf32>
    %cst_38 = arith.constant dense<0.000000e+00> : vector<8x128xf32>
    %200 = tpu.matmul %180, %14, %cst_38 {dimension_numbers = #tpu.dot_dimension_numbers<[1], [0], [0], [1], [0, 0, 1, 1], [], []>} : vector<8x32xf32>, vector<32x128xf32>, vector<8x128xf32> -> vector<8x128xf32>
    %201 = arith.addf %200, %18 : vector<8x128xf32>
    %cst_39 = arith.constant dense<0.000000e+00> : vector<8x128xf32>
    %202 = tpu.matmul %196, %15, %cst_39 {dimension_numbers = #tpu.dot_dimension_numbers<[1], [0], [0], [1], [0, 0, 1, 1], [], []>} : vector<8x32xf32>, vector<32x128xf32>, vector<8x128xf32> -> vector<8x128xf32>
    %203 = arith.addf %201, %202 : vector<8x128xf32>
    %204 = arith.negf %199 : vector<8x128xf32>
    %205 = math.exp %204 : vector<8x128xf32>
    %cst_40 = arith.constant 1.000000e+00 : f32
    %206 = vector.broadcast %cst_40 : f32 to vector<8x128xf32>
    %207 = arith.addf %206, %205 : vector<8x128xf32>
    %208 = arith.divf %206, %207 : vector<8x128xf32>
    %209 = math.tanh %199 : vector<8x128xf32>
    %210 = arith.select %24, %209, %208 : vector<8x128xi1>, vector<8x128xf32>
    %211 = vector.extract_strided_slice %210 {offsets = [0, 0], sizes = [8, 32], strides = [1, 1]} : vector<8x128xf32> to vector<8x32xf32>
    %212 = vector.extract_strided_slice %210 {offsets = [0, 32], sizes = [8, 32], strides = [1, 1]} : vector<8x128xf32> to vector<8x32xf32>
    %213 = vector.extract_strided_slice %210 {offsets = [0, 64], sizes = [8, 32], strides = [1, 1]} : vector<8x128xf32> to vector<8x32xf32>
    %214 = vector.extract_strided_slice %210 {offsets = [0, 96], sizes = [8, 32], strides = [1, 1]} : vector<8x128xf32> to vector<8x32xf32>
    %215 = arith.mulf %212, %178 : vector<8x32xf32>
    %216 = arith.mulf %211, %213 : vector<8x32xf32>
    %217 = arith.addf %215, %216 : vector<8x32xf32>
    %218 = math.tanh %217 : vector<8x32xf32>
    %219 = arith.mulf %214, %218 : vector<8x32xf32>
    %220 = arith.negf %203 : vector<8x128xf32>
    %221 = math.exp %220 : vector<8x128xf32>
    %cst_41 = arith.constant 1.000000e+00 : f32
    %222 = vector.broadcast %cst_41 : f32 to vector<8x128xf32>
    %223 = arith.addf %222, %221 : vector<8x128xf32>
    %224 = arith.divf %222, %223 : vector<8x128xf32>
    %225 = math.tanh %203 : vector<8x128xf32>
    %226 = arith.select %24, %225, %224 : vector<8x128xi1>, vector<8x128xf32>
    %227 = vector.extract_strided_slice %226 {offsets = [0, 0], sizes = [8, 32], strides = [1, 1]} : vector<8x128xf32> to vector<8x32xf32>
    %228 = vector.extract_strided_slice %226 {offsets = [0, 32], sizes = [8, 32], strides = [1, 1]} : vector<8x128xf32> to vector<8x32xf32>
    %229 = vector.extract_strided_slice %226 {offsets = [0, 64], sizes = [8, 32], strides = [1, 1]} : vector<8x128xf32> to vector<8x32xf32>
    %230 = vector.extract_strided_slice %226 {offsets = [0, 96], sizes = [8, 32], strides = [1, 1]} : vector<8x128xf32> to vector<8x32xf32>
    %231 = arith.mulf %228, %194 : vector<8x32xf32>
    %232 = arith.mulf %227, %229 : vector<8x32xf32>
    %233 = arith.addf %231, %232 : vector<8x32xf32>
    %234 = math.tanh %233 : vector<8x32xf32>
    %235 = arith.mulf %230, %234 : vector<8x32xf32>
    %236 = vector.extract_strided_slice %12 {offsets = [48, 0], sizes = [8, 128], strides = [1, 1]} : vector<64x128xf32> to vector<8x128xf32>
    %cst_42 = arith.constant dense<0.000000e+00> : vector<8x128xf32>
    %237 = tpu.matmul %219, %13, %cst_42 {dimension_numbers = #tpu.dot_dimension_numbers<[1], [0], [0], [1], [0, 0, 1, 1], [], []>} : vector<8x32xf32>, vector<32x128xf32>, vector<8x128xf32> -> vector<8x128xf32>
    %238 = arith.addf %236, %237 : vector<8x128xf32>
    %cst_43 = arith.constant dense<0.000000e+00> : vector<8x128xf32>
    %239 = tpu.matmul %219, %14, %cst_43 {dimension_numbers = #tpu.dot_dimension_numbers<[1], [0], [0], [1], [0, 0, 1, 1], [], []>} : vector<8x32xf32>, vector<32x128xf32>, vector<8x128xf32> -> vector<8x128xf32>
    %240 = arith.addf %239, %18 : vector<8x128xf32>
    %cst_44 = arith.constant dense<0.000000e+00> : vector<8x128xf32>
    %241 = tpu.matmul %235, %15, %cst_44 {dimension_numbers = #tpu.dot_dimension_numbers<[1], [0], [0], [1], [0, 0, 1, 1], [], []>} : vector<8x32xf32>, vector<32x128xf32>, vector<8x128xf32> -> vector<8x128xf32>
    %242 = arith.addf %240, %241 : vector<8x128xf32>
    %243 = arith.negf %238 : vector<8x128xf32>
    %244 = math.exp %243 : vector<8x128xf32>
    %cst_45 = arith.constant 1.000000e+00 : f32
    %245 = vector.broadcast %cst_45 : f32 to vector<8x128xf32>
    %246 = arith.addf %245, %244 : vector<8x128xf32>
    %247 = arith.divf %245, %246 : vector<8x128xf32>
    %248 = math.tanh %238 : vector<8x128xf32>
    %249 = arith.select %24, %248, %247 : vector<8x128xi1>, vector<8x128xf32>
    %250 = vector.extract_strided_slice %249 {offsets = [0, 0], sizes = [8, 32], strides = [1, 1]} : vector<8x128xf32> to vector<8x32xf32>
    %251 = vector.extract_strided_slice %249 {offsets = [0, 32], sizes = [8, 32], strides = [1, 1]} : vector<8x128xf32> to vector<8x32xf32>
    %252 = vector.extract_strided_slice %249 {offsets = [0, 64], sizes = [8, 32], strides = [1, 1]} : vector<8x128xf32> to vector<8x32xf32>
    %253 = vector.extract_strided_slice %249 {offsets = [0, 96], sizes = [8, 32], strides = [1, 1]} : vector<8x128xf32> to vector<8x32xf32>
    %254 = arith.mulf %251, %217 : vector<8x32xf32>
    %255 = arith.mulf %250, %252 : vector<8x32xf32>
    %256 = arith.addf %254, %255 : vector<8x32xf32>
    %257 = math.tanh %256 : vector<8x32xf32>
    %258 = arith.mulf %253, %257 : vector<8x32xf32>
    %259 = arith.negf %242 : vector<8x128xf32>
    %260 = math.exp %259 : vector<8x128xf32>
    %cst_46 = arith.constant 1.000000e+00 : f32
    %261 = vector.broadcast %cst_46 : f32 to vector<8x128xf32>
    %262 = arith.addf %261, %260 : vector<8x128xf32>
    %263 = arith.divf %261, %262 : vector<8x128xf32>
    %264 = math.tanh %242 : vector<8x128xf32>
    %265 = arith.select %24, %264, %263 : vector<8x128xi1>, vector<8x128xf32>
    %266 = vector.extract_strided_slice %265 {offsets = [0, 0], sizes = [8, 32], strides = [1, 1]} : vector<8x128xf32> to vector<8x32xf32>
    %267 = vector.extract_strided_slice %265 {offsets = [0, 32], sizes = [8, 32], strides = [1, 1]} : vector<8x128xf32> to vector<8x32xf32>
    %268 = vector.extract_strided_slice %265 {offsets = [0, 64], sizes = [8, 32], strides = [1, 1]} : vector<8x128xf32> to vector<8x32xf32>
    %269 = vector.extract_strided_slice %265 {offsets = [0, 96], sizes = [8, 32], strides = [1, 1]} : vector<8x128xf32> to vector<8x32xf32>
    %270 = arith.mulf %267, %233 : vector<8x32xf32>
    %271 = arith.mulf %266, %268 : vector<8x32xf32>
    %272 = arith.addf %270, %271 : vector<8x32xf32>
    %273 = math.tanh %272 : vector<8x32xf32>
    %274 = arith.mulf %269, %273 : vector<8x32xf32>
    %275 = vector.extract_strided_slice %12 {offsets = [56, 0], sizes = [8, 128], strides = [1, 1]} : vector<64x128xf32> to vector<8x128xf32>
    %cst_47 = arith.constant dense<0.000000e+00> : vector<8x128xf32>
    %276 = tpu.matmul %258, %13, %cst_47 {dimension_numbers = #tpu.dot_dimension_numbers<[1], [0], [0], [1], [0, 0, 1, 1], [], []>} : vector<8x32xf32>, vector<32x128xf32>, vector<8x128xf32> -> vector<8x128xf32>
    %277 = arith.addf %275, %276 : vector<8x128xf32>
    %cst_48 = arith.constant dense<0.000000e+00> : vector<8x128xf32>
    %278 = tpu.matmul %258, %14, %cst_48 {dimension_numbers = #tpu.dot_dimension_numbers<[1], [0], [0], [1], [0, 0, 1, 1], [], []>} : vector<8x32xf32>, vector<32x128xf32>, vector<8x128xf32> -> vector<8x128xf32>
    %279 = arith.addf %278, %18 : vector<8x128xf32>
    %cst_49 = arith.constant dense<0.000000e+00> : vector<8x128xf32>
    %280 = tpu.matmul %274, %15, %cst_49 {dimension_numbers = #tpu.dot_dimension_numbers<[1], [0], [0], [1], [0, 0, 1, 1], [], []>} : vector<8x32xf32>, vector<32x128xf32>, vector<8x128xf32> -> vector<8x128xf32>
    %281 = arith.addf %279, %280 : vector<8x128xf32>
    %282 = arith.negf %277 : vector<8x128xf32>
    %283 = math.exp %282 : vector<8x128xf32>
    %cst_50 = arith.constant 1.000000e+00 : f32
    %284 = vector.broadcast %cst_50 : f32 to vector<8x128xf32>
    %285 = arith.addf %284, %283 : vector<8x128xf32>
    %286 = arith.divf %284, %285 : vector<8x128xf32>
    %287 = math.tanh %277 : vector<8x128xf32>
    %288 = arith.select %24, %287, %286 : vector<8x128xi1>, vector<8x128xf32>
    %289 = vector.extract_strided_slice %288 {offsets = [0, 0], sizes = [8, 32], strides = [1, 1]} : vector<8x128xf32> to vector<8x32xf32>
    %290 = vector.extract_strided_slice %288 {offsets = [0, 32], sizes = [8, 32], strides = [1, 1]} : vector<8x128xf32> to vector<8x32xf32>
    %291 = vector.extract_strided_slice %288 {offsets = [0, 64], sizes = [8, 32], strides = [1, 1]} : vector<8x128xf32> to vector<8x32xf32>
    %292 = vector.extract_strided_slice %288 {offsets = [0, 96], sizes = [8, 32], strides = [1, 1]} : vector<8x128xf32> to vector<8x32xf32>
    %293 = arith.mulf %290, %256 : vector<8x32xf32>
    %294 = arith.mulf %289, %291 : vector<8x32xf32>
    %295 = arith.addf %293, %294 : vector<8x32xf32>
    %296 = math.tanh %295 : vector<8x32xf32>
    %297 = arith.mulf %292, %296 : vector<8x32xf32>
    %298 = arith.negf %281 : vector<8x128xf32>
    %299 = math.exp %298 : vector<8x128xf32>
    %cst_51 = arith.constant 1.000000e+00 : f32
    %300 = vector.broadcast %cst_51 : f32 to vector<8x128xf32>
    %301 = arith.addf %300, %299 : vector<8x128xf32>
    %302 = arith.divf %300, %301 : vector<8x128xf32>
    %303 = math.tanh %281 : vector<8x128xf32>
    %304 = arith.select %24, %303, %302 : vector<8x128xi1>, vector<8x128xf32>
    %305 = vector.extract_strided_slice %304 {offsets = [0, 0], sizes = [8, 32], strides = [1, 1]} : vector<8x128xf32> to vector<8x32xf32>
    %306 = vector.extract_strided_slice %304 {offsets = [0, 32], sizes = [8, 32], strides = [1, 1]} : vector<8x128xf32> to vector<8x32xf32>
    %307 = vector.extract_strided_slice %304 {offsets = [0, 64], sizes = [8, 32], strides = [1, 1]} : vector<8x128xf32> to vector<8x32xf32>
    %308 = vector.extract_strided_slice %304 {offsets = [0, 96], sizes = [8, 32], strides = [1, 1]} : vector<8x128xf32> to vector<8x32xf32>
    %309 = arith.mulf %306, %272 : vector<8x32xf32>
    %310 = arith.mulf %305, %307 : vector<8x32xf32>
    %311 = arith.addf %309, %310 : vector<8x32xf32>
    %312 = math.tanh %311 : vector<8x32xf32>
    %313 = arith.mulf %308, %312 : vector<8x32xf32>
    %cst_52 = arith.constant dense<0.000000e+00> : vector<8x128xf32>
    %314 = tpu.matmul %297, %14, %cst_52 {dimension_numbers = #tpu.dot_dimension_numbers<[1], [0], [0], [1], [0, 0, 1, 1], [], []>} : vector<8x32xf32>, vector<32x128xf32>, vector<8x128xf32> -> vector<8x128xf32>
    %315 = arith.addf %314, %18 : vector<8x128xf32>
    %cst_53 = arith.constant dense<0.000000e+00> : vector<8x128xf32>
    %316 = tpu.matmul %313, %15, %cst_53 {dimension_numbers = #tpu.dot_dimension_numbers<[1], [0], [0], [1], [0, 0, 1, 1], [], []>} : vector<8x32xf32>, vector<32x128xf32>, vector<8x128xf32> -> vector<8x128xf32>
    %317 = arith.addf %315, %316 : vector<8x128xf32>
    %318 = arith.negf %317 : vector<8x128xf32>
    %319 = math.exp %318 : vector<8x128xf32>
    %cst_54 = arith.constant 1.000000e+00 : f32
    %320 = vector.broadcast %cst_54 : f32 to vector<8x128xf32>
    %321 = arith.addf %320, %319 : vector<8x128xf32>
    %322 = arith.divf %320, %321 : vector<8x128xf32>
    %323 = math.tanh %317 : vector<8x128xf32>
    %324 = arith.select %24, %323, %322 : vector<8x128xi1>, vector<8x128xf32>
    %325 = vector.extract_strided_slice %324 {offsets = [0, 0], sizes = [8, 32], strides = [1, 1]} : vector<8x128xf32> to vector<8x32xf32>
    %326 = vector.extract_strided_slice %324 {offsets = [0, 32], sizes = [8, 32], strides = [1, 1]} : vector<8x128xf32> to vector<8x32xf32>
    %327 = vector.extract_strided_slice %324 {offsets = [0, 64], sizes = [8, 32], strides = [1, 1]} : vector<8x128xf32> to vector<8x32xf32>
    %328 = vector.extract_strided_slice %324 {offsets = [0, 96], sizes = [8, 32], strides = [1, 1]} : vector<8x128xf32> to vector<8x32xf32>
    %329 = arith.mulf %326, %311 : vector<8x32xf32>
    %330 = arith.mulf %325, %327 : vector<8x32xf32>
    %331 = arith.addf %329, %330 : vector<8x32xf32>
    %332 = math.tanh %331 : vector<8x32xf32>
    %333 = arith.mulf %328, %332 : vector<8x32xf32>
    %c0_55 = arith.constant 0 : index
    %c0_56 = arith.constant 0 : index
    %334 = vector.load %arg8[%c0_55, %c0_56] : memref<32x256xf32, #tpu.memory_space<vmem>>, vector<32x256xf32>
    %cst_57 = arith.constant dense<0.000000e+00> : vector<8x256xf32>
    %335 = tpu.matmul %333, %334, %cst_57 {dimension_numbers = #tpu.dot_dimension_numbers<[1], [0], [0], [1], [0, 0, 1, 1], [], []>} : vector<8x32xf32>, vector<32x256xf32>, vector<8x256xf32> -> vector<8x256xf32>
    %c0_58 = arith.constant 0 : index
    %c0_59 = arith.constant 0 : index
    %336 = vector.load %arg9[%c0_58, %c0_59] : memref<1x256xf32, #tpu.memory_space<vmem>>, vector<1x256xf32>
    %337 = vector.broadcast %336 : vector<1x256xf32> to vector<8x256xf32>
    %338 = arith.addf %335, %337 : vector<8x256xf32>
    %c0_60 = arith.constant 0 : index
    %c0_61 = arith.constant 0 : index
    %339 = vector.load %arg10[%c0_60, %c0_61] : memref<8x256xf32, #tpu.memory_space<vmem>>, vector<8x256xf32>
    tpu.vector_store %arg10[%c0_60, %c0_61], %338 {strides = array<i32>} : memref<8x256xf32, #tpu.memory_space<vmem>>, vector<8x256xf32>,
    return
  }
}

</mosaic_0001>

<bundles_post_ra>
// kernel: caption_lstm_forward.1
= control target key start
LH: loop header
LB: loop body
LE: loop exit
PB: predicated region body
PF: predicated region fallthrough
CT: control target
= control target key end

     0   :  { %v3159_v0 = vmov 0   ;;  %v3160_v18 = vmov 0.0   ;;  %v43_v19 = vlaneseq  ;;  %vm101_vm0 = vcmask 523264   ;;  %s3162_s13 = smov 32   ;;  %s3867_s0 = inlined_call_operand.vmem [shape: s32[64,1], index: 0, kind: input, shape index: {}]   ;;  %s3868_s1 = inlined_call_operand.vmem [shape: f32[64,32], index: 1, kind: input, shape index: {}]   ;;  %s3869_s2 = inlined_call_operand.vmem [shape: f32[32,128], index: 2, kind: input, shape index: {}]   ;;  %s3870_s4 = inlined_call_operand.vmem [shape: f32[1,128], index: 4, kind: input, shape index: {}]   ;;  %s3871_s3 = inlined_call_operand.vmem [shape: f32[32,128], index: 3, kind: input, shape index: {}]   ;;  %s3872_s5 = inlined_call_operand.vmem [shape: f32[32,128], index: 5, kind: input, shape index: {}]   ;;  %s3873_s7 = inlined_call_operand.vmem [shape: f32[1,128], index: 7, kind: input, shape index: {}]   ;;  %s3874_s6 = inlined_call_operand.vmem [shape: f32[32,128], index: 6, kind: input, shape index: {}]   ;;  %s3875_s8 = inlined_call_operand.vmem [shape: f32[32,256], index: 8, kind: input, shape index: {}]   ;;  %s3876_s9 = inlined_call_operand.vmem [shape: f32[1,256], index: 9, kind: input, shape index: {}]   ;;  %s3877_s10 = inlined_call_operand.vmem [shape: f32[8,256], index: 10, kind: output, shape index: {}]  }
   0x1   :  { %3023 = vset.pattern.permute.xlu0 %v3159_v0  ;;  %v35_v1 = vld [vmem:[%s3867_s0] sm:$0xff]  ;;  %3024 = vset.pattern.permute.xlu1 %v3159_v0  ;;  %v37_v2 = vld [vmem:[%s3867_s0 + $0x10] sm:$0xff]  ;;  %v36_v3 = vld [vmem:[%s3867_s0 + $0x8] sm:$0xff]  ;;  %vm242_vm8 = vcmask 261120   ;;  %vm3163_vm13 = vmmov 0  }
   0x2   :  { %46 = vperm.xlu0 %3023, %v35_v1   ;;  %52 = vperm.xlu1 %3024, %v37_v2   ;;  %v38_v4 = vld [vmem:[%s3867_s0 + $0x18] sm:$0xff]  ;;  %v99_v6 = vld [vmem:[%s3868_s1 + $0x30] sm:$0xff]  ;;  %v98_v7 = vld [vmem:[%s3868_s1 + $0x28] sm:$0xff]  ;;  %v3272_v20 = vand.u32 127, %v43_v19 }
   0x3   :  { %v100_v5 = vld [vmem:[%s3868_s1 + $0x38] sm:$0xff]  ;;  %v39_v8 = vld [vmem:[%s3867_s0 + $0x20] sm:$0xff]  ;;  %v40_v9 = vld [vmem:[%s3867_s0 + $0x28] sm:$0xff] }
   0x4   :  { %2728 = vmatprep.subr.mxu0 %v100_v5  ;;  %v97_v10 = vld [vmem:[%s3868_s1 + $0x20] sm:$0xff]  ;;  %v41_v11 = vld [vmem:[%s3867_s0 + $0x30] sm:$0xff]  ;;  %v96_v12 = vld [vmem:[%s3868_s1 + $0x18] sm:$0xff]  ;;  %vm391_vm9 = vcmp.ge.s32.totalorder %v3272_v20, 64  ;;  %vm392_vm10 = vcmp.lt.s32.totalorder %v3272_v20, 96 }
   0x5   :  { %2729 = vmatpush3.msra.mxu0 %v100_v5  ;;  %v95_v13 = vld [vmem:[%s3868_s1 + $0x10] sm:$0xff]  ;;  %v234_v14 = vld [vmem:[%s3869_s2 + $0x18] sm:$0xff]  ;;  %v94_v16 = vld [vmem:[%s3868_s1 + $0x8] sm:$0xff] }
   0x6   :  { %49 = vperm.xlu0 %3023, %v36_v3   ;;  %55 = vperm.xlu1 %3024, %v38_v4   ;;  %v233_v15 = vld [vmem:[%s3869_s2 + $0x10] sm:$0xff]  ;;  %v93_v17 = vld [vmem:[%s3868_s1] sm:$0xff]  ;;  %v232_v35 = vld [vmem:[%s3869_s2 + $0x8] sm:$0xff] }
   0x7   :  { %2730 = vmatprep.subr.mxu0 %v99_v6  ;;  %2756 = vmatprep.subr.mxu1 %v234_v14  ;;  %v231_v36 = vld [vmem:[%s3869_s2] sm:$0xff]  ;;  %v42_v39 = vld [vmem:[%s3867_s0 + $0x38] sm:$0xff]  ;;  %vm3317_vm11 = vmand %vm391_vm9, %vm392_vm10  ;;  %s3161_s0 = smov 64  }
   0x8   :  { %2731 = vmatpush3.msra.mxu0 %v99_v6  ;;  %2757 = vmatpush3.msra.mxu1 %v234_v14  ;;  %v3312_v41 = vld [vmem:[%s3870_s4] ss:$0 sm:$0xff]  ;;  %v3334_v59 = vld [vmem:[%s3871_s3 + $0x18] sm:$0xff]  ;;  %v3347_v62 = vld [vmem:[%s3871_s3 + $0x10] sm:$0xff] }
   0x9   :  { %2732 = vmatprep.subr.mxu0 %v98_v7  ;;  %2758 = vmatprep.subr.mxu1 %v233_v15  ;;  %v3339_v60 = vld [vmem:[%s3872_s5 + $0x18] sm:$0xff]  ;;  %v3353_v63 = vld [vmem:[%s3872_s5 + $0x10] sm:$0xff]  ;;  %v3361_v1 = vld [vmem:[%s3871_s3 + $0x8] sm:$0xff] }
   0xa   :  { %58 = vperm.xlu0 %3023, %v39_v8   ;;  %61 = vperm.xlu1 %3024, %v40_v9   ;;  %v3370_v3 = vld [vmem:[%s3871_s3] sm:$0xff]  ;;  %v3376_v4 = vld [vmem:[%s3872_s5 + $0x8] sm:$0xff] }
   0xb   :  { %2733 = vmatpush3.msra.mxu0 %v98_v7  ;;  %2759 = vmatpush3.msra.mxu1 %v233_v15  ;;  %v3387_v6 = vld [vmem:[%s3872_s5] sm:$0xff]  ;;  %v2428_v47 = vld [vmem:[%s3875_s8 + $0x28] sm:$0xff] }
   0xc   :  { %2734 = vmatprep.subr.mxu0 %v97_v10  ;;  %2760 = vmatprep.subr.mxu1 %v232_v35 }
   0xd   :  { %2735 = vmatpush3.msra.mxu0 %v97_v10  ;;  %2761 = vmatpush3.msra.mxu1 %v232_v35 }
   0xe   :  { %64 = vperm.xlu0 %3023, %v41_v11   ;;  %2736 = vmatprep.subr.mxu0 %v96_v12 }
   0xf   :  { %2737 = vmatpush3.msra.mxu0 %v96_v12  ;;  %2762 = vmatprep.subr.mxu1 %v231_v36 }
  0x10   :  { %2738 = vmatprep.subr.mxu0 %v95_v13  ;;  %2763 = vmatpush3.msra.mxu1 %v231_v36 }
  0x11   :  { %2739 = vmatpush3.msra.mxu0 %v95_v13  ;;  %2776 = vmatprep.subr.mxu1 %v3160_v18 }
  0x12   :  { %2740 = vmatprep.subr.mxu0 %v94_v16  ;;  %67 = vperm.xlu1 %3024, %v42_v39  }
  0x13   :  { %2741 = vmatpush3.msra.mxu0 %v94_v16 }
  0x14   :  { %2742 = vmatprep.subr.mxu0 %v93_v17 }
  0x15   :  { %2743 = vmatpush3.msra.mxu0 %v93_v17 }
  0x16   :  { %2787 = vmatprep.subr.mxu0 %v3160_v18 }
  0x7d   :  { %v47_v21 = vpop.permute.xlu0 %46  ;;  %v53_v22 = vpop.permute.xlu1 %52 }
  0x7e   :  { %vm69_vm1 = vcmp.eq.s32.totalorder %v47_v21, %v3272_v20  ;;  %vm71_vm2 = vcmp.eq.s32.totalorder %v53_v22, %v3272_v20 }
  0x7f   :  { %v2525_v23 = vsel %vm69_vm1, 1.0, %v3160_v18  ;;  %v2527_v26 = vsel %vm71_vm2, 1.0, %v3160_v18 }
  0x80   :  { %2744 = vmatprep.mubr.msk.f32.mxu0 %vm101_vm0, %v2525_v23 }
  0x81   :  { %v50_v24 = vpop.permute.xlu0 %49  ;;  %v56_v25 = vpop.permute.xlu1 %55 }
  0x82   :  { %vm70_vm3 = vcmp.eq.s32.totalorder %v50_v24, %v3272_v20  ;;  %vm72_vm4 = vcmp.eq.s32.totalorder %v56_v25, %v3272_v20 }
  0x83   :  { %v2526_v27 = vsel %vm70_vm3, 1.0, %v3160_v18  ;;  %v2528_v28 = vsel %vm72_vm4, 1.0, %v3160_v18 }
  0x84   :  { %2745 = vmatmul.mubr.msk.f32.vlgmr.msra.gmra.mxu0 %vm101_vm0, %v2526_v27 }
  0x85   :  { %v59_v29 = vpop.permute.xlu0 %58  ;;  %2747 = vmatprep.mubr.msk.f32.mxu0 %vm101_vm0, %v2527_v26  ;;  %v62_v30 = vpop.permute.xlu1 %61  ;;  %2788 = vmatpush3.msra.mxu0 %v3339_v60 }
  0x86   :  { %vm73_vm5 = vcmp.eq.s32.totalorder %v59_v29, %v3272_v20  ;;  %vm74_vm6 = vcmp.eq.s32.totalorder %v62_v30, %v3272_v20  ;;  %2789 = vmatprep.subr.mxu0 %v3160_v18 }
  0x87   :  { %v2529_v31 = vsel %vm73_vm5, 1.0, %v3160_v18  ;;  %v2530_v32 = vsel %vm74_vm6, 1.0, %v3160_v18  ;;  %2790 = vmatpush3.msra.mxu0 %v3353_v63 }
  0x88   :  { %2748 = vmatmul.mubr.msk.f32.gmra.mxu0 %vm101_vm0, %v2528_v28  ;;  %2791 = vmatprep.subr.mxu0 %v3160_v18 }
  0x89   :  { %2750 = vmatprep.mubr.msk.f32.mxu0 %vm101_vm0, %v2529_v31  ;;  %v65_v33 = vpop.permute.xlu0 %64  ;;  %2792 = vmatpush3.msra.mxu0 %v3376_v4 }
  0x8a   :  { %vm75_vm7 = vcmp.eq.s32.totalorder %v65_v33, %v3272_v20  ;;  %2793 = vmatprep.subr.mxu0 %v3160_v18 }
  0x8b   :  { %v2531_v34 = vsel %vm75_vm7, 1.0, %v3160_v18  ;;  %2794 = vmatpush3.msra.mxu0 %v3387_v6 }
  0x8c   :  { %2751 = vmatmul.mubr.msk.f32.gmra.mxu0 %vm101_vm0, %v2530_v32  ;;  %2809 = vmatprep.subr.mxu0 %v3160_v18 }
  0x8d   :  { %2753 = vmatprep.mubr.msk.f32.mxu0 %vm101_vm0, %v2531_v34  ;;  %v68_v48 = vpop.permute.xlu1 %67 }
  0x8e   :  { %vm76_vm12 = vcmp.eq.s32.totalorder %v68_v48, %v3272_v20  ;;  %v3436_v20 = vld [vmem:[%s3873_s7] ss:$0 sm:$0xff] }
  0x8f   :  { %v2532_v51 = vsel %vm76_vm12, 1.0, %v3160_v18 }
  0x90   :  { %2754 = vmatmul.mubr.msk.f32.gmra.mxu0 %vm101_vm0, %v2532_v51 }
  0x91   :  { %2795 = vmatprep.mubr.msk.f32.mxu0 %vm3163_vm13, %v3160_v18 }
 0x144   :  { %v2746_v37 = vpop.f32.mrf.mxu0 }
 0x146   :  { %v192_v38 = vpop.f32.mrf.mxu0 }
 0x147   :  { %2764 = vmatprep.mubr.msk.f32.mxu1 %vm242_vm8, %v192_v38 }
 0x148   :  { %2765 = vmatmul.mubr.msk.f32.vlgmr.msra.gmra.mxu1 %vm242_vm8, %v2746_v37  ;;  %v2749_v58 = vpop.f32.mrf.mxu0 }
 0x149   :  { %2777 = vmatpush3.msra.mxu1 %v3334_v59 }
 0x14a   :  { %v202_v61 = vpop.f32.mrf.mxu0  ;;  %2778 = vmatprep.subr.mxu1 %v3160_v18 }
 0x14b   :  { %2767 = vmatprep.mubr.msk.f32.mxu1 %vm242_vm8, %v202_v61  ;;  %2779 = vmatpush3.msra.mxu1 %v3347_v62 }
 0x14c   :  { %v2752_v0 = vpop.f32.mrf.mxu0  ;;  %2768 = vmatmul.mubr.msk.f32.gmra.mxu1 %vm242_vm8, %v2749_v58  ;;  %2780 = vmatprep.subr.mxu1 %v3160_v18  ;;  %v3463_v58 = vld [vmem:[%s3874_s6 + $0x18] sm:$0xff] }
 0x14d   :  { %2781 = vmatpush3.msra.mxu1 %v3361_v1 }
 0x14e   :  { %v212_v2 = vpop.f32.mrf.mxu0  ;;  %2782 = vmatprep.subr.mxu1 %v3160_v18 }
 0x14f   :  { %2770 = vmatprep.mubr.msk.f32.mxu1 %vm242_vm8, %v212_v2  ;;  %2783 = vmatpush3.msra.mxu1 %v3370_v3  ;;  %v3479_v2 = vld [vmem:[%s3874_s6 + $0x8] sm:$0xff] }
 0x150   :  { %v2755_v5 = vpop.f32.mrf.mxu0  ;;  %2771 = vmatmul.mubr.msk.f32.gmra.mxu1 %vm242_vm8, %v2752_v0  ;;  %2798 = vmatprep.subr.mxu1 %v3160_v18  ;;  %v3470_v0 = vld [vmem:[%s3874_s6 + $0x10] sm:$0xff] }
 0x152   :  { %v222_v8 = vpop.f32.mrf.mxu0 }
 0x153   :  { %2773 = vmatprep.mubr.msk.f32.mxu1 %vm242_vm8, %v222_v8 }
 0x154   :  { %2774 = vmatmul.mubr.msk.f32.gmra.mxu1 %vm242_vm8, %v2755_v5  ;;  %v3488_v5 = vld [vmem:[%s3874_s6] sm:$0xff] }
 0x155   :  { %2784 = vmatprep.mubr.msk.f32.mxu1 %vm3163_vm13, %v3160_v18 }
 0x208   :  { %v3307_v40 = vpop.f32.mrf.mxu1 }
 0x209   :  { %v339_v21 = vadd.f32 %v3307_v40, %v3312_v41 }
 0x20a   :  { %v333_v42 = vpop.f32.mrf.mxu1 }
 0x20b   :  { %v334_v43 = vadd.f32 %v3312_v41, %v333_v42 }
 0x20c   :  { %v3421_v12 = vpop.f32.mrf.mxu1 }
 0x20d   :  { %v2551_v44 = vmul.f32 -1.442695, %v334_v43 }
 0x20e   :  { %v3423_v13 = vpop.f32.mrf.mxu1 }
 0x20f   :  { %3025 = vpow2.f32 %v2551_v44  ;;  %v344_v8 = vadd.f32 %v3312_v41, %v3423_v13 }
 0x210   :  { %3027 = vtanh.f32 %v334_v43  ;;  %v3425_v14 = vpop.f32.mrf.mxu1 }
 0x212   :  { %v3427_v15 = vpop.f32.mrf.mxu1 }
 0x214   :  { %v3429_v16 = vpop.f32.mrf.mxu1 }
 0x216   :  { %v3431_v17 = vpop.f32.mrf.mxu1 }
 0x21c   :  { %v3026_v45 = vpop.eup %3025 }
 0x21d   :  { %v397_v46 = vadd.f32 1.0, %v3026_v45  ;;  %v3028_v49 = vpop.eup %3027 }
 0x21f   :  { %3029 = vrcp.f32 %v397_v46 }
 0x22c   :  { %v3030_v50 = vpop.eup %3029 }
 0x22d   :  { %v401_v52 = vsel %vm3317_vm11, %v3028_v49, %v3030_v50 }
 0x22e   :  { %404 = vrot.lane.b32.xlu0 %v401_v52, %s3161_s0  ;;  %v402_v55 = vmul.f32 0.0, %v401_v52 }
 0x2a0   :  { %v405_v53 = vpop.permute.xlu0 %404 }
 0x2a1   :  { %v407_v54 = vmul.f32 %v405_v53, %v401_v52 }
 0x2a3   :  { %409 = vrot.lane.b32.xlu1 %v407_v54, %s3162_s13 }
 0x315   :  { %v410_v56 = vpop.permute.xlu1 %409 }
 0x316   :  { %v3328_v57 = vadd.f32 %v410_v56, %v402_v55 }
 0x318   :  { %3031 = vtanh.f32 %v3328_v57 }
 0x325   :  { %v3032_v7 = vpop.eup %3031 }
 0x326   :  { %415 = vrot.lane.b32.xlu0 %v3032_v7, %s3161_s0 }
 0x398   :  { %v416_v9 = vpop.permute.xlu0 %415 }
 0x399   :  { %v418_v10 = vmul.f32 %v416_v9, %v401_v52 }
 0x39b   :  { %420 = vrot.lane.b32.xlu1 %v418_v10, %s3162_s13 }
 0x40d   :  { %v421_v11 = vpop.permute.xlu1 %420 }
 0x40e   :  { %2785 = vmatmul.mubr.msk.f32.vlgmr.msra.gmra.mxu1 %vm242_vm8, %v421_v11  ;;  %2796 = vmatmul.mubr.msk.f32.vlgmr.msra.gmra.mxu0 %vm242_vm8, %v421_v11 }
 0x40f   :  { %2799 = vmatpush3.msra.mxu1 %v3334_v59  ;;  %2810 = vmatpush3.msra.mxu0 %v3339_v60 }
 0x410   :  { %2800 = vmatprep.subr.mxu1 %v3160_v18  ;;  %2811 = vmatprep.subr.mxu0 %v3160_v18 }
 0x411   :  { %2801 = vmatpush3.msra.mxu1 %v3347_v62  ;;  %2812 = vmatpush3.msra.mxu0 %v3353_v63 }
 0x412   :  { %2802 = vmatprep.subr.mxu1 %v3160_v18  ;;  %2813 = vmatprep.subr.mxu0 %v3160_v18 }
 0x413   :  { %2803 = vmatpush3.msra.mxu1 %v3361_v1  ;;  %2814 = vmatpush3.msra.mxu0 %v3376_v4 }
 0x414   :  { %2804 = vmatprep.subr.mxu1 %v3160_v18  ;;  %2815 = vmatprep.subr.mxu0 %v3160_v18 }
 0x415   :  { %2805 = vmatpush3.msra.mxu1 %v3370_v3  ;;  %2816 = vmatpush3.msra.mxu0 %v3387_v6 }
 0x416   :  { %2817 = vmatprep.mubr.msk.f32.mxu0 %vm3163_vm13, %v3160_v18  ;;  %2806 = vmatprep.mubr.msk.f32.mxu1 %vm3163_vm13, %v3160_v18 }
 0x417   :  { %2820 = vmatprep.subr.mxu1 %v3160_v18  ;;  %2831 = vmatprep.subr.mxu0 %v3160_v18 }
 0x4ce   :  { %v490_v22 = vpop.f32.mrf.mxu1  ;;  %v561_v23 = vpop.f32.mrf.mxu0 }
 0x4cf   :  { %v494_v24 = vadd.f32 %v490_v22, %v339_v21  ;;  %v562_v25 = vadd.f32 %v3436_v20, %v561_v23 }
 0x4d0   :  { %v2786_v26 = vpop.f32.mrf.mxu1  ;;  %v2797_v27 = vpop.f32.mrf.mxu0 }
 0x4d1   :  { %v2554_v28 = vmul.f32 -1.442695, %v494_v24  ;;  %v2555_v29 = vmul.f32 -1.442695, %v562_v25 }
 0x4d3   :  { %3033 = vpow2.f32 %v2554_v28 }
 0x4d4   :  { %3035 = vpow2.f32 %v2555_v29 }
 0x4d5   :  { %3037 = vtanh.f32 %v494_v24 }
 0x4d6   :  { %3039 = vtanh.f32 %v562_v25 }
 0x4e0   :  { %v3034_v30 = vpop.eup %3033 }
 0x4e1   :  { %v3036_v31 = vpop.eup %3035  ;;  %v568_v32 = vadd.f32 1.0, %v3034_v30 }
 0x4e2   :  { %v593_v33 = vadd.f32 1.0, %v3036_v31  ;;  %v3038_v34 = vpop.eup %3037 }
 0x4e3   :  { %3041 = vrcp.f32 %v568_v32  ;;  %v3040_v35 = vpop.eup %3039 }
 0x4e4   :  { %3043 = vrcp.f32 %v593_v33 }
 0x4f0   :  { %v3042_v36 = vpop.eup %3041 }
 0x4f1   :  { %v3044_v37 = vpop.eup %3043  ;;  %v572_v38 = vsel %vm3317_vm11, %v3038_v34, %v3042_v36 }
 0x4f2   :  { %v597_v39 = vsel %vm3317_vm11, %v3040_v35, %v3044_v37  ;;  %575 = vrot.lane.b32.xlu0 %v572_v38, %s3161_s0  ;;  %v573_v45 = vmul.f32 %v572_v38, %v3328_v57 }
 0x4f3   :  { %600 = vrot.lane.b32.xlu1 %v597_v39, %s3161_s0  ;;  %v598_v46 = vmul.f32 0.0, %v597_v39 }
 0x564   :  { %v576_v40 = vpop.permute.xlu0 %575 }
 0x565   :  { %v601_v42 = vpop.permute.xlu1 %600  ;;  %v578_v43 = vmul.f32 %v576_v40, %v572_v38 }
 0x566   :  { %v603_v44 = vmul.f32 %v601_v42, %v597_v39 }
 0x567   :  { %580 = vrot.lane.b32.xlu0 %v578_v43, %s3162_s13 }
 0x568   :  { %605 = vrot.lane.b32.xlu1 %v603_v44, %s3162_s13 }
 0x5d9   :  { %v581_v48 = vpop.permute.xlu0 %580 }
 0x5da   :  { %v606_v49 = vpop.permute.xlu1 %605  ;;  %v3450_v50 = vadd.f32 %v581_v48, %v573_v45 }
 0x5db   :  { %v3452_v51 = vadd.f32 %v606_v49, %v598_v46 }
 0x5dc   :  { %3045 = vtanh.f32 %v3450_v50 }
 0x5dd   :  { %3047 = vtanh.f32 %v3452_v51 }
 0x5e9   :  { %v3046_v52 = vpop.eup %3045 }
 0x5ea   :  { %v3048_v53 = vpop.eup %3047  ;;  %586 = vrot.lane.b32.xlu0 %v3046_v52, %s3161_s0 }
 0x5eb   :  { %611 = vrot.lane.b32.xlu1 %v3048_v53, %s3161_s0 }
 0x65c   :  { %v587_v54 = vpop.permute.xlu0 %586 }
 0x65d   :  { %v612_v55 = vpop.permute.xlu1 %611  ;;  %v589_v56 = vmul.f32 %v587_v54, %v572_v38 }
 0x65e   :  { %v614_v57 = vmul.f32 %v612_v55, %v597_v39 }
 0x65f   :  { %616 = vrot.lane.b32.xlu0 %v589_v56, %s3162_s13 }
 0x660   :  { %762 = vrot.lane.b32.xlu1 %v614_v57, %s3162_s13 }
 0x6d1   :  { %v617_v61 = vpop.permute.xlu0 %616 }
 0x6d2   :  { %2807 = vmatmul.mubr.msk.f32.vlgmr.msra.gmra.mxu1 %vm242_vm8, %v617_v61  ;;  %2818 = vmatmul.mubr.msk.f32.vlgmr.msra.gmra.mxu0 %vm242_vm8, %v617_v61  ;;  %v763_v7 = vpop.permute.xlu1 %762  ;;  %v349_v61 = vadd.f32 %v3421_v12, %v3312_v41 }
 0x6d3   :  { %2821 = vmatpush3.msra.mxu1 %v3463_v58  ;;  %2828 = vmatprep.mubr.msk.f32.mxu1 %vm3163_vm13, %v3160_v18 }
 0x6d4   :  { %2822 = vmatprep.subr.mxu1 %v3160_v18  ;;  %2832 = vmatpush3.msra.mxu0 %v3334_v59 }
 0x6d5   :  { %2823 = vmatpush3.msra.mxu1 %v3470_v0  ;;  %2833 = vmatprep.subr.mxu0 %v3160_v18 }
 0x6d6   :  { %2824 = vmatprep.subr.mxu1 %v3160_v18  ;;  %2834 = vmatpush3.msra.mxu0 %v3347_v62 }
 0x6d7   :  { %2825 = vmatpush3.msra.mxu1 %v3479_v2  ;;  %2835 = vmatprep.subr.mxu0 %v3160_v18 }
 0x6d8   :  { %2826 = vmatprep.subr.mxu1 %v3160_v18  ;;  %2836 = vmatpush3.msra.mxu0 %v3361_v1 }
 0x6d9   :  { %2827 = vmatpush3.msra.mxu1 %v3488_v5  ;;  %2837 = vmatprep.subr.mxu0 %v3160_v18 }
 0x6da   :  { %2829 = vmatmul.mubr.msk.f32.vlgmr.msra.gmra.mxu1 %vm242_vm8, %v763_v7  ;;  %2842 = vmatprep.subr.mxu1 %v3160_v18 }
 0x6db   :  { %2843 = vmatpush3.msra.mxu1 %v3339_v60  ;;  %2838 = vmatpush3.msra.mxu0 %v3370_v3 }
 0x6dc   :  { %2844 = vmatprep.subr.mxu1 %v3160_v18  ;;  %2839 = vmatprep.mubr.msk.f32.mxu0 %vm3163_vm13, %v3160_v18 }
 0x6dd   :  { %2845 = vmatpush3.msra.mxu1 %v3353_v63  ;;  %2850 = vmatprep.mubr.msk.f32.mxu1 %vm3163_vm13, %v3160_v18 }
 0x6de   :  { %2846 = vmatprep.subr.mxu1 %v3160_v18  ;;  %2853 = vmatprep.subr.mxu0 %v3160_v18 }
 0x6df   :  { %2847 = vmatpush3.msra.mxu1 %v3376_v4 }
 0x6e0   :  { %2848 = vmatprep.subr.mxu1 %v3160_v18 }
 0x6e1   :  { %2849 = vmatpush3.msra.mxu1 %v3387_v6 }
 0x6e2   :  { %2864 = vmatprep.subr.mxu1 %v3160_v18 }
 0x792   :  { %v686_v9 = vpop.f32.mrf.mxu1  ;;  %v757_v10 = vpop.f32.mrf.mxu0 }
 0x793   :  { %v690_v11 = vadd.f32 %v686_v9, %v344_v8  ;;  %v758_v24 = vadd.f32 %v3436_v20, %v757_v10 }
 0x794   :  { %v2808_v21 = vpop.f32.mrf.mxu1  ;;  %v2819_v22 = vpop.f32.mrf.mxu0 }
 0x795   :  { %v2559_v23 = vmul.f32 -1.442695, %v690_v11 }
 0x797   :  { %3049 = vpow2.f32 %v2559_v23 }
 0x79a   :  { %v832_v25 = vpop.f32.mrf.mxu1 }
 0x79b   :  { %v836_v26 = vadd.f32 %v832_v25, %v758_v24 }
 0x79c   :  { %v2830_v27 = vpop.f32.mrf.mxu1 }
 0x79d   :  { %v2560_v28 = vmul.f32 -1.442695, %v836_v26 }
 0x79f   :  { %3051 = vpow2.f32 %v2560_v28 }
 0x7a0   :  { %3053 = vtanh.f32 %v690_v11 }
 0x7a4   :  { %v3050_v29 = vpop.eup %3049 }
 0x7a5   :  { %v840_v30 = vadd.f32 1.0, %v3050_v29 }
 0x7a7   :  { %3055 = vrcp.f32 %v840_v30 }
 0x7a8   :  { %3057 = vtanh.f32 %v836_v26 }
 0x7ac   :  { %v3052_v31 = vpop.eup %3051 }
 0x7ad   :  { %v865_v13 = vadd.f32 1.0, %v3052_v31  ;;  %v3054_v32 = vpop.eup %3053 }
 0x7af   :  { %3059 = vrcp.f32 %v865_v13 }
 0x7b4   :  { %v3056_v33 = vpop.eup %3055 }
 0x7b5   :  { %v844_v34 = vsel %vm3317_vm11, %v3054_v32, %v3056_v33  ;;  %v3058_v35 = vpop.eup %3057 }
 0x7b6   :  { %847 = vrot.lane.b32.xlu0 %v844_v34, %s3161_s0  ;;  %v845_v43 = vmul.f32 %v844_v34, %v3450_v50 }
 0x7bc   :  { %v3060_v36 = vpop.eup %3059 }
 0x7bd   :  { %v869_v37 = vsel %vm3317_vm11, %v3058_v35, %v3060_v36 }
 0x7be   :  { %872 = vrot.lane.b32.xlu1 %v869_v37, %s3161_s0  ;;  %v870_v46 = vmul.f32 %v869_v37, %v3452_v51 }
 0x828   :  { %v848_v38 = vpop.permute.xlu0 %847 }
 0x829   :  { %v850_v39 = vmul.f32 %v848_v38, %v844_v34 }
 0x82b   :  { %852 = vrot.lane.b32.xlu0 %v850_v39, %s3162_s13 }
 0x830   :  { %v873_v40 = vpop.permute.xlu1 %872 }
 0x831   :  { %v875_v42 = vmul.f32 %v873_v40, %v869_v37 }
 0x833   :  { %877 = vrot.lane.b32.xlu1 %v875_v42, %s3162_s13 }
 0x89d   :  { %v853_v44 = vpop.permute.xlu0 %852 }
 0x89e   :  { %v3525_v45 = vadd.f32 %v853_v44, %v845_v43 }
 0x8a0   :  { %3061 = vtanh.f32 %v3525_v45 }
 0x8a5   :  { %v878_v48 = vpop.permute.xlu1 %877 }
 0x8a6   :  { %v3529_v49 = vadd.f32 %v878_v48, %v870_v46 }
 0x8a8   :  { %3063 = vtanh.f32 %v3529_v49 }
 0x8ad   :  { %v3062_v52 = vpop.eup %3061 }
 0x8ae   :  { %858 = vrot.lane.b32.xlu0 %v3062_v52, %s3161_s0 }
 0x8b5   :  { %v3064_v53 = vpop.eup %3063 }
 0x8b6   :  { %883 = vrot.lane.b32.xlu1 %v3064_v53, %s3161_s0 }
 0x920   :  { %v859_v54 = vpop.permute.xlu0 %858 }
 0x921   :  { %v861_v50 = vmul.f32 %v859_v54, %v844_v34 }
 0x923   :  { %888 = vrot.lane.b32.xlu0 %v861_v50, %s3162_s13 }
 0x928   :  { %v884_v55 = vpop.permute.xlu1 %883 }
 0x929   :  { %v886_v56 = vmul.f32 %v884_v55, %v869_v37 }
 0x92b   :  { %1034 = vrot.lane.b32.xlu1 %v886_v56, %s3162_s13  ;;  %v354_v56 = vadd.f32 %v3312_v41, %v3427_v15 }
 0x995   :  { %v889_v51 = vpop.permute.xlu0 %888 }
 0x996   :  { %2840 = vmatmul.mubr.msk.f32.vlgmr.msra.gmra.mxu0 %vm242_vm8, %v889_v51  ;;  %2851 = vmatmul.mubr.msk.f32.vlgmr.msra.gmra.mxu1 %vm242_vm8, %v889_v51 }
 0x997   :  { %2854 = vmatpush3.msra.mxu0 %v3463_v58  ;;  %2861 = vmatprep.mubr.msk.f32.mxu0 %vm3163_vm13, %v3160_v18 }
 0x998   :  { %2855 = vmatprep.subr.mxu0 %v3160_v18  ;;  %2865 = vmatpush3.msra.mxu1 %v3334_v59 }
 0x999   :  { %2856 = vmatpush3.msra.mxu0 %v3470_v0  ;;  %2866 = vmatprep.subr.mxu1 %v3160_v18 }
 0x99a   :  { %2857 = vmatprep.subr.mxu0 %v3160_v18  ;;  %2867 = vmatpush3.msra.mxu1 %v3347_v62 }
 0x99b   :  { %2858 = vmatpush3.msra.mxu0 %v3479_v2  ;;  %2868 = vmatprep.subr.mxu1 %v3160_v18 }
 0x99c   :  { %2859 = vmatprep.subr.mxu0 %v3160_v18  ;;  %2869 = vmatpush3.msra.mxu1 %v3361_v1 }
 0x99d   :  { %2860 = vmatpush3.msra.mxu0 %v3488_v5  ;;  %v1035_v57 = vpop.permute.xlu1 %1034  ;;  %2870 = vmatprep.subr.mxu1 %v3160_v18 }
 0x99e   :  { %2862 = vmatmul.mubr.msk.f32.vlgmr.msra.gmra.mxu0 %vm242_vm8, %v1035_v57  ;;  %2875 = vmatprep.subr.mxu0 %v3160_v18 }
 0x99f   :  { %2876 = vmatpush3.msra.mxu0 %v3339_v60  ;;  %2871 = vmatpush3.msra.mxu1 %v3370_v3 }
 0x9a0   :  { %2877 = vmatprep.subr.mxu0 %v3160_v18  ;;  %2872 = vmatprep.mubr.msk.f32.mxu1 %vm3163_vm13, %v3160_v18 }
 0x9a1   :  { %2878 = vmatpush3.msra.mxu0 %v3353_v63  ;;  %2886 = vmatprep.subr.mxu1 %v3160_v18 }
 0x9a2   :  { %2879 = vmatprep.subr.mxu0 %v3160_v18  ;;  %2883 = vmatprep.mubr.msk.f32.mxu0 %vm3163_vm13, %v3160_v18 }
 0x9a3   :  { %2880 = vmatpush3.msra.mxu0 %v3376_v4 }
 0x9a4   :  { %2881 = vmatprep.subr.mxu0 %v3160_v18 }
 0x9a5   :  { %2882 = vmatpush3.msra.mxu0 %v3387_v6 }
 0x9a6   :  { %2897 = vmatprep.subr.mxu0 %v3160_v18 }
 0xa56   :  { %v958_v7 = vpop.f32.mrf.mxu0  ;;  %v1029_v8 = vpop.f32.mrf.mxu1 }
 0xa57   :  { %v962_v9 = vadd.f32 %v958_v7, %v349_v61  ;;  %v1030_v22 = vadd.f32 %v3436_v20, %v1029_v8 }
 0xa58   :  { %v2841_v10 = vpop.f32.mrf.mxu0  ;;  %v2852_v11 = vpop.f32.mrf.mxu1 }
 0xa59   :  { %v2564_v21 = vmul.f32 -1.442695, %v962_v9 }
 0xa5b   :  { %3065 = vpow2.f32 %v2564_v21 }
 0xa5e   :  { %v1104_v23 = vpop.f32.mrf.mxu0 }
 0xa5f   :  { %v1108_v24 = vadd.f32 %v1104_v23, %v1030_v22 }
 0xa60   :  { %v2863_v25 = vpop.f32.mrf.mxu0 }
 0xa61   :  { %v2565_v26 = vmul.f32 -1.442695, %v1108_v24 }
 0xa63   :  { %3067 = vpow2.f32 %v2565_v26 }
 0xa64   :  { %3069 = vtanh.f32 %v962_v9 }
 0xa68   :  { %v3066_v27 = vpop.eup %3065 }
 0xa69   :  { %v1112_v28 = vadd.f32 1.0, %v3066_v27 }
 0xa6b   :  { %3071 = vrcp.f32 %v1112_v28 }
 0xa6c   :  { %3073 = vtanh.f32 %v1108_v24 }
 0xa70   :  { %v3068_v29 = vpop.eup %3067 }
 0xa71   :  { %v1137_v12 = vadd.f32 1.0, %v3068_v29  ;;  %v3070_v30 = vpop.eup %3069 }
 0xa73   :  { %3075 = vrcp.f32 %v1137_v12 }
 0xa78   :  { %v3072_v31 = vpop.eup %3071 }
 0xa79   :  { %v1116_v13 = vsel %vm3317_vm11, %v3070_v30, %v3072_v31  ;;  %v3074_v32 = vpop.eup %3073 }
 0xa7a   :  { %1119 = vrot.lane.b32.xlu0 %v1116_v13, %s3161_s0  ;;  %v1117_v39 = vmul.f32 %v1116_v13, %v3525_v45 }
 0xa80   :  { %v3076_v33 = vpop.eup %3075 }
 0xa81   :  { %v1141_v34 = vsel %vm3317_vm11, %v3074_v32, %v3076_v33 }
 0xa82   :  { %1144 = vrot.lane.b32.xlu1 %v1141_v34, %s3161_s0  ;;  %v1142_v43 = vmul.f32 %v1141_v34, %v3529_v49 }
 0xaec   :  { %v1120_v35 = vpop.permute.xlu0 %1119 }
 0xaed   :  { %v1122_v36 = vmul.f32 %v1120_v35, %v1116_v13 }
 0xaef   :  { %1124 = vrot.lane.b32.xlu0 %v1122_v36, %s3162_s13 }
 0xaf4   :  { %v1145_v37 = vpop.permute.xlu1 %1144 }
 0xaf5   :  { %v1147_v38 = vmul.f32 %v1145_v37, %v1141_v34 }
 0xaf7   :  { %1149 = vrot.lane.b32.xlu1 %v1147_v38, %s3162_s13 }
 0xb61   :  { %v1125_v40 = vpop.permute.xlu0 %1124 }
 0xb62   :  { %v3581_v42 = vadd.f32 %v1125_v40, %v1117_v39 }
 0xb64   :  { %3077 = vtanh.f32 %v3581_v42 }
 0xb69   :  { %v1150_v44 = vpop.permute.xlu1 %1149 }
 0xb6a   :  { %v3585_v46 = vadd.f32 %v1150_v44, %v1142_v43 }
 0xb6c   :  { %3079 = vtanh.f32 %v3585_v46 }
 0xb71   :  { %v3078_v48 = vpop.eup %3077 }
 0xb72   :  { %1130 = vrot.lane.b32.xlu0 %v3078_v48, %s3161_s0 }
 0xb79   :  { %v3080_v52 = vpop.eup %3079 }
 0xb7a   :  { %1155 = vrot.lane.b32.xlu1 %v3080_v52, %s3161_s0 }
 0xbe4   :  { %v1131_v53 = vpop.permute.xlu0 %1130 }
 0xbe5   :  { %v1133_v45 = vmul.f32 %v1131_v53, %v1116_v13 }
 0xbe7   :  { %1160 = vrot.lane.b32.xlu0 %v1133_v45, %s3162_s13 }
 0xbec   :  { %v1156_v54 = vpop.permute.xlu1 %1155 }
 0xbed   :  { %v1158_v50 = vmul.f32 %v1156_v54, %v1141_v34  ;;  %v359_v54 = vadd.f32 %v3425_v14, %v3312_v41 }
 0xbef   :  { %1306 = vrot.lane.b32.xlu1 %v1158_v50, %s3162_s13 }
 0xc59   :  { %v1161_v49 = vpop.permute.xlu0 %1160 }
 0xc5a   :  { %2873 = vmatmul.mubr.msk.f32.vlgmr.msra.gmra.mxu1 %vm242_vm8, %v1161_v49  ;;  %2884 = vmatmul.mubr.msk.f32.vlgmr.msra.gmra.mxu0 %vm242_vm8, %v1161_v49 }
 0xc5b   :  { %2887 = vmatpush3.msra.mxu1 %v3463_v58  ;;  %2894 = vmatprep.mubr.msk.f32.mxu1 %vm3163_vm13, %v3160_v18 }
 0xc5c   :  { %2888 = vmatprep.subr.mxu1 %v3160_v18  ;;  %2898 = vmatpush3.msra.mxu0 %v3334_v59 }
 0xc5d   :  { %2889 = vmatpush3.msra.mxu1 %v3470_v0  ;;  %2899 = vmatprep.subr.mxu0 %v3160_v18 }
 0xc5e   :  { %2890 = vmatprep.subr.mxu1 %v3160_v18  ;;  %2900 = vmatpush3.msra.mxu0 %v3347_v62 }
 0xc5f   :  { %2891 = vmatpush3.msra.mxu1 %v3479_v2  ;;  %2901 = vmatprep.subr.mxu0 %v3160_v18 }
 0xc60   :  { %2892 = vmatprep.subr.mxu1 %v3160_v18  ;;  %2902 = vmatpush3.msra.mxu0 %v3361_v1 }
 0xc61   :  { %2893 = vmatpush3.msra.mxu1 %v3488_v5  ;;  %v1307_v55 = vpop.permute.xlu1 %1306  ;;  %2903 = vmatprep.subr.mxu0 %v3160_v18 }
 0xc62   :  { %2895 = vmatmul.mubr.msk.f32.vlgmr.msra.gmra.mxu1 %vm242_vm8, %v1307_v55  ;;  %2908 = vmatprep.subr.mxu1 %v3160_v18 }
 0xc63   :  { %2909 = vmatpush3.msra.mxu1 %v3339_v60  ;;  %2904 = vmatpush3.msra.mxu0 %v3370_v3 }
 0xc64   :  { %2910 = vmatprep.subr.mxu1 %v3160_v18  ;;  %2905 = vmatprep.mubr.msk.f32.mxu0 %vm3163_vm13, %v3160_v18 }
 0xc65   :  { %2911 = vmatpush3.msra.mxu1 %v3353_v63  ;;  %2916 = vmatprep.mubr.msk.f32.mxu1 %vm3163_vm13, %v3160_v18 }
 0xc66   :  { %2912 = vmatprep.subr.mxu1 %v3160_v18  ;;  %2919 = vmatprep.subr.mxu0 %v3160_v18 }
 0xc67   :  { %2913 = vmatpush3.msra.mxu1 %v3376_v4 }
 0xc68   :  { %2914 = vmatprep.subr.mxu1 %v3160_v18 }
 0xc69   :  { %2915 = vmatpush3.msra.mxu1 %v3387_v6 }
 0xc6a   :  { %2930 = vmatprep.subr.mxu1 %v3160_v18 }
 0xd1a   :  { %v1230_v51 = vpop.f32.mrf.mxu1  ;;  %v1301_v57 = vpop.f32.mrf.mxu0 }
 0xd1b   :  { %v1234_v61 = vadd.f32 %v1230_v51, %v354_v56  ;;  %v1302_v10 = vadd.f32 %v3436_v20, %v1301_v57 }
 0xd1c   :  { %v2874_v7 = vpop.f32.mrf.mxu1  ;;  %v2885_v8 = vpop.f32.mrf.mxu0 }
 0xd1d   :  { %v2569_v9 = vmul.f32 -1.442695, %v1234_v61 }
 0xd1f   :  { %3081 = vpow2.f32 %v2569_v9 }
 0xd22   :  { %v1376_v11 = vpop.f32.mrf.mxu1 }
 0xd23   :  { %v1380_v21 = vadd.f32 %v1376_v11, %v1302_v10 }
 0xd24   :  { %v2896_v22 = vpop.f32.mrf.mxu1 }
 0xd25   :  { %v2570_v23 = vmul.f32 -1.442695, %v1380_v21 }
 0xd27   :  { %3083 = vpow2.f32 %v2570_v23 }
 0xd28   :  { %3085 = vtanh.f32 %v1234_v61 }
 0xd2c   :  { %v3082_v24 = vpop.eup %3081 }
 0xd2d   :  { %v1384_v25 = vadd.f32 1.0, %v3082_v24 }
 0xd2f   :  { %3087 = vrcp.f32 %v1384_v25 }
 0xd30   :  { %3089 = vtanh.f32 %v1380_v21 }
 0xd34   :  { %v3084_v26 = vpop.eup %3083 }
 0xd35   :  { %v1409_v15 = vadd.f32 1.0, %v3084_v26  ;;  %v3086_v27 = vpop.eup %3085 }
 0xd37   :  { %3091 = vrcp.f32 %v1409_v15 }
 0xd3c   :  { %v3088_v28 = vpop.eup %3087 }
 0xd3d   :  { %v1388_v29 = vsel %vm3317_vm11, %v3086_v27, %v3088_v28  ;;  %v3090_v12 = vpop.eup %3089 }
 0xd3e   :  { %1391 = vrot.lane.b32.xlu0 %v1388_v29, %s3161_s0  ;;  %v1389_v35 = vmul.f32 %v1388_v29, %v3581_v42 }
 0xd44   :  { %v3092_v30 = vpop.eup %3091 }
 0xd45   :  { %v1413_v31 = vsel %vm3317_vm11, %v3090_v12, %v3092_v30 }
 0xd46   :  { %1416 = vrot.lane.b32.xlu1 %v1413_v31, %s3161_s0  ;;  %v1414_v38 = vmul.f32 %v1413_v31, %v3585_v46 }
 0xdb0   :  { %v1392_v13 = vpop.permute.xlu0 %1391 }
 0xdb1   :  { %v1394_v32 = vmul.f32 %v1392_v13, %v1388_v29 }
 0xdb3   :  { %1396 = vrot.lane.b32.xlu0 %v1394_v32, %s3162_s13 }
 0xdb8   :  { %v1417_v33 = vpop.permute.xlu1 %1416 }
 0xdb9   :  { %v1419_v34 = vmul.f32 %v1417_v33, %v1413_v31 }
 0xdbb   :  { %1421 = vrot.lane.b32.xlu1 %v1419_v34, %s3162_s13 }
 0xe25   :  { %v1397_v36 = vpop.permute.xlu0 %1396 }
 0xe26   :  { %v3637_v37 = vadd.f32 %v1397_v36, %v1389_v35 }
 0xe28   :  { %3093 = vtanh.f32 %v3637_v37 }
 0xe2d   :  { %v1422_v39 = vpop.permute.xlu1 %1421 }
 0xe2e   :  { %v3641_v40 = vadd.f32 %v1422_v39, %v1414_v38 }
 0xe30   :  { %3095 = vtanh.f32 %v3641_v40 }
 0xe35   :  { %v3094_v43 = vpop.eup %3093 }
 0xe36   :  { %1402 = vrot.lane.b32.xlu0 %v3094_v43, %s3161_s0 }
 0xe3d   :  { %v3096_v44 = vpop.eup %3095 }
 0xe3e   :  { %1427 = vrot.lane.b32.xlu1 %v3096_v44, %s3161_s0 }
 0xea8   :  { %v1403_v48 = vpop.permute.xlu0 %1402 }
 0xea9   :  { %v1405_v42 = vmul.f32 %v1403_v48, %v1388_v29 }
 0xeab   :  { %1432 = vrot.lane.b32.xlu0 %v1405_v42, %s3162_s13 }
 0xeb0   :  { %v1428_v52 = vpop.permute.xlu1 %1427 }
 0xeb1   :  { %v1430_v53 = vmul.f32 %v1428_v52, %v1413_v31 }
 0xeb3   :  { %1578 = vrot.lane.b32.xlu1 %v1430_v53, %s3162_s13 }
 0xf1d   :  { %v1433_v46 = vpop.permute.xlu0 %1432 }
 0xf1e   :  { %2906 = vmatmul.mubr.msk.f32.vlgmr.msra.gmra.mxu0 %vm242_vm8, %v1433_v46  ;;  %2917 = vmatmul.mubr.msk.f32.vlgmr.msra.gmra.mxu1 %vm242_vm8, %v1433_v46 }
 0xf1f   :  { %2920 = vmatpush3.msra.mxu0 %v3463_v58  ;;  %2927 = vmatprep.mubr.msk.f32.mxu0 %vm3163_vm13, %v3160_v18 }
 0xf20   :  { %2921 = vmatprep.subr.mxu0 %v3160_v18  ;;  %2931 = vmatpush3.msra.mxu1 %v3334_v59 }
 0xf21   :  { %2922 = vmatpush3.msra.mxu0 %v3470_v0  ;;  %2932 = vmatprep.subr.mxu1 %v3160_v18 }
 0xf22   :  { %2923 = vmatprep.subr.mxu0 %v3160_v18  ;;  %2933 = vmatpush3.msra.mxu1 %v3347_v62 }
 0xf23   :  { %2924 = vmatpush3.msra.mxu0 %v3479_v2  ;;  %2934 = vmatprep.subr.mxu1 %v3160_v18 }
 0xf24   :  { %2925 = vmatprep.subr.mxu0 %v3160_v18  ;;  %2935 = vmatpush3.msra.mxu1 %v3361_v1 }
 0xf25   :  { %2926 = vmatpush3.msra.mxu0 %v3488_v5  ;;  %v1579_v45 = vpop.permute.xlu1 %1578  ;;  %2936 = vmatprep.subr.mxu1 %v3160_v18 }
 0xf26   :  { %2928 = vmatmul.mubr.msk.f32.vlgmr.msra.gmra.mxu0 %vm242_vm8, %v1579_v45  ;;  %2941 = vmatprep.subr.mxu0 %v3160_v18 }
 0xf27   :  { %2942 = vmatpush3.msra.mxu0 %v3339_v60  ;;  %2937 = vmatpush3.msra.mxu1 %v3370_v3 }
 0xf28   :  { %2943 = vmatprep.subr.mxu0 %v3160_v18  ;;  %2938 = vmatprep.mubr.msk.f32.mxu1 %vm3163_vm13, %v3160_v18 }
 0xf29   :  { %2944 = vmatpush3.msra.mxu0 %v3353_v63  ;;  %2952 = vmatprep.subr.mxu1 %v3160_v18 }
 0xf2a   :  { %2945 = vmatprep.subr.mxu0 %v3160_v18  ;;  %2949 = vmatprep.mubr.msk.f32.mxu0 %vm3163_vm13, %v3160_v18 }
 0xf2b   :  { %2946 = vmatpush3.msra.mxu0 %v3376_v4 }
 0xf2c   :  { %2947 = vmatprep.subr.mxu0 %v3160_v18 }
 0xf2d   :  { %2948 = vmatpush3.msra.mxu0 %v3387_v6 }
 0xf2e   :  { %2963 = vmatprep.subr.mxu0 %v3160_v18 }
 0xfde   :  { %v1502_v50 = vpop.f32.mrf.mxu0  ;;  %v1573_v49 = vpop.f32.mrf.mxu1 }
 0xfdf   :  { %v1506_v55 = vadd.f32 %v1502_v50, %v359_v54  ;;  %v1574_v61 = vadd.f32 %v3436_v20, %v1573_v49 }
 0xfe0   :  { %v2907_v56 = vpop.f32.mrf.mxu0  ;;  %v2918_v51 = vpop.f32.mrf.mxu1 }
 0xfe1   :  { %v2574_v57 = vmul.f32 -1.442695, %v1506_v55 }
 0xfe3   :  { %3097 = vpow2.f32 %v2574_v57 }
 0xfe6   :  { %v1648_v7 = vpop.f32.mrf.mxu0 }
 0xfe7   :  { %v1652_v8 = vadd.f32 %v1648_v7, %v1574_v61 }
 0xfe8   :  { %v2929_v9 = vpop.f32.mrf.mxu0 }
 0xfe9   :  { %v2575_v10 = vmul.f32 -1.442695, %v1652_v8 }
 0xfeb   :  { %3099 = vpow2.f32 %v2575_v10 }
 0xfec   :  { %3101 = vtanh.f32 %v1506_v55 }
 0xff0   :  { %v3098_v11 = vpop.eup %3097 }
 0xff1   :  { %v1656_v21 = vadd.f32 1.0, %v3098_v11 }
 0xff3   :  { %3103 = vrcp.f32 %v1656_v21 }
 0xff4   :  { %3105 = vtanh.f32 %v1652_v8 }
 0xff8   :  { %v3100_v22 = vpop.eup %3099 }
 0xff9   :  { %v1681_v41 = vadd.f32 1.0, %v3100_v22  ;;  %v3102_v14 = vpop.eup %3101 }
 0xffb   :  { %3107 = vrcp.f32 %v1681_v41 }
0x1000   :  { %v3104_v23 = vpop.eup %3103 }
0x1001   :  { %v1660_v24 = vsel %vm3317_vm11, %v3102_v14, %v3104_v23  ;;  %v3106_v25 = vpop.eup %3105 }
0x1002   :  { %1663 = vrot.lane.b32.xlu0 %v1660_v24, %s3161_s0  ;;  %v1661_v30 = vmul.f32 %v1660_v24, %v3637_v37 }
0x1008   :  { %v3108_v26 = vpop.eup %3107 }
0x1009   :  { %v1685_v15 = vsel %vm3317_vm11, %v3106_v25, %v3108_v26 }
0x100a   :  { %1688 = vrot.lane.b32.xlu1 %v1685_v15, %s3161_s0  ;;  %v1686_v32 = vmul.f32 %v1685_v15, %v3641_v40 }
0x1074   :  { %v1664_v27 = vpop.permute.xlu0 %1663 }
0x1075   :  { %v1666_v28 = vmul.f32 %v1664_v27, %v1660_v24 }
0x1077   :  { %1668 = vrot.lane.b32.xlu0 %v1666_v28, %s3162_s13 }
0x107c   :  { %v1689_v29 = vpop.permute.xlu1 %1688 }
0x107d   :  { %v1691_v12 = vmul.f32 %v1689_v29, %v1685_v15  ;;  %v3154_v29 = vld [vmem:[%s3872_s5 + $0x18] sm:$0xff] }
0x107f   :  { %1693 = vrot.lane.b32.xlu1 %v1691_v12, %s3162_s13  ;;  %v3155_v12 = vld [vmem:[%s3872_s5 + $0x10] sm:$0xff] }
0x10e9   :  { %v1669_v31 = vpop.permute.xlu0 %1668 }
0x10ea   :  { %v3693_v13 = vadd.f32 %v1669_v31, %v1661_v30  ;;  %v3156_v30 = vld [vmem:[%s3872_s5 + $0x8] sm:$0xff] }
0x10ec   :  { %3109 = vtanh.f32 %v3693_v13 }
0x10f1   :  { %v1694_v33 = vpop.permute.xlu1 %1693 }
0x10f2   :  { %v3697_v34 = vadd.f32 %v1694_v33, %v1686_v32 }
0x10f4   :  { %3111 = vtanh.f32 %v3697_v34 }
0x10f9   :  { %v3110_v35 = vpop.eup %3109 }
0x10fa   :  { %1674 = vrot.lane.b32.xlu0 %v3110_v35, %s3161_s0 }
0x1101   :  { %v3112_v36 = vpop.eup %3111 }
0x1102   :  { %1699 = vrot.lane.b32.xlu1 %v3112_v36, %s3161_s0 }
0x116c   :  { %v1675_v38 = vpop.permute.xlu0 %1674 }
0x116d   :  { %v1677_v37 = vmul.f32 %v1675_v38, %v1660_v24 }
0x116f   :  { %1704 = vrot.lane.b32.xlu0 %v1677_v37, %s3162_s13 }
0x1174   :  { %v1700_v39 = vpop.permute.xlu1 %1699 }
0x1175   :  { %v1702_v43 = vmul.f32 %v1700_v39, %v1685_v15 }
0x1177   :  { %1850 = vrot.lane.b32.xlu1 %v1702_v43, %s3162_s13 }
0x11e1   :  { %v1705_v40 = vpop.permute.xlu0 %1704 }
0x11e2   :  { %2939 = vmatmul.mubr.msk.f32.vlgmr.msra.gmra.mxu1 %vm242_vm8, %v1705_v40  ;;  %2950 = vmatmul.mubr.msk.f32.vlgmr.msra.gmra.mxu0 %vm242_vm8, %v1705_v40 }
0x11e3   :  { %2953 = vmatpush3.msra.mxu1 %v3463_v58  ;;  %2960 = vmatprep.mubr.msk.f32.mxu1 %vm3163_vm13, %v3160_v18 }
0x11e4   :  { %2954 = vmatprep.subr.mxu1 %v3160_v18  ;;  %2964 = vmatpush3.msra.mxu0 %v3334_v59  ;;  %v3740_v59 = vld [vmem:[%s3870_s4] ss:$0 sm:$0xff] }
0x11e5   :  { %2955 = vmatpush3.msra.mxu1 %v3470_v0  ;;  %2965 = vmatprep.subr.mxu0 %v3160_v18  ;;  %v369_v32 = vadd.f32 %v3740_v59, %v3429_v16 }
0x11e6   :  { %2956 = vmatprep.subr.mxu1 %v3160_v18  ;;  %2966 = vmatpush3.msra.mxu0 %v3347_v62 }
0x11e7   :  { %2957 = vmatpush3.msra.mxu1 %v3479_v2  ;;  %2967 = vmatprep.subr.mxu0 %v3160_v18 }
0x11e8   :  { %2958 = vmatprep.subr.mxu1 %v3160_v18  ;;  %2968 = vmatpush3.msra.mxu0 %v3361_v1 }
0x11e9   :  { %2959 = vmatpush3.msra.mxu1 %v3488_v5  ;;  %v1851_v44 = vpop.permute.xlu1 %1850  ;;  %2969 = vmatprep.subr.mxu0 %v3160_v18 }
0x11ea   :  { %2961 = vmatmul.mubr.msk.f32.vlgmr.msra.gmra.mxu1 %vm242_vm8, %v1851_v44  ;;  %2974 = vmatprep.subr.mxu1 %v3160_v18 }
0x11eb   :  { %2975 = vmatpush3.msra.mxu1 %v3339_v60  ;;  %2970 = vmatpush3.msra.mxu0 %v3370_v3  ;;  %v364_v60 = vadd.f32 %v3740_v59, %v3431_v17 }
0x11ec   :  { %2976 = vmatprep.subr.mxu1 %v3160_v18  ;;  %2971 = vmatprep.mubr.msk.f32.mxu0 %vm3163_vm13, %v3160_v18 }
0x11ed   :  { %2977 = vmatpush3.msra.mxu1 %v3353_v63  ;;  %2982 = vmatprep.mubr.msk.f32.mxu1 %vm3163_vm13, %v3160_v18 }
0x11ee   :  { %2978 = vmatprep.subr.mxu1 %v3160_v18  ;;  %2985 = vmatprep.subr.mxu0 %v3160_v18 }
0x11ef   :  { %2979 = vmatpush3.msra.mxu1 %v3376_v4 }
0x11f0   :  { %2980 = vmatprep.subr.mxu1 %v3160_v18 }
0x11f1   :  { %2981 = vmatpush3.msra.mxu1 %v3387_v6 }
0x11f2   :  { %2996 = vmatprep.subr.mxu1 %v3160_v18 }
0x12a2   :  { %v1774_v62 = vpop.f32.mrf.mxu1  ;;  %v1845_v63 = vpop.f32.mrf.mxu0 }
0x12a3   :  { %v1778_v1 = vadd.f32 %v1774_v62, %v364_v60  ;;  %v1846_v42 = vadd.f32 %v3436_v20, %v1845_v63 }
0x12a4   :  { %v2940_v3 = vpop.f32.mrf.mxu1  ;;  %v2951_v48 = vpop.f32.mrf.mxu0 }
0x12a5   :  { %v2579_v4 = vmul.f32 -1.442695, %v1778_v1 }
0x12a7   :  { %3113 = vpow2.f32 %v2579_v4 }
0x12aa   :  { %v1920_v6 = vpop.f32.mrf.mxu1 }
0x12ab   :  { %v1924_v52 = vadd.f32 %v1920_v6, %v1846_v42 }
0x12ac   :  { %v2962_v53 = vpop.f32.mrf.mxu1 }
0x12ad   :  { %v2580_v46 = vmul.f32 -1.442695, %v1924_v52 }
0x12af   :  { %3115 = vpow2.f32 %v2580_v46 }
0x12b0   :  { %3117 = vtanh.f32 %v1778_v1 }
0x12b4   :  { %v3114_v45 = vpop.eup %3113 }
0x12b5   :  { %v1928_v54 = vadd.f32 1.0, %v3114_v45 }
0x12b7   :  { %3119 = vrcp.f32 %v1928_v54 }
0x12b8   :  { %3121 = vtanh.f32 %v1924_v52 }
0x12bc   :  { %v3116_v50 = vpop.eup %3115 }
0x12bd   :  { %v1953_v17 = vadd.f32 1.0, %v3116_v50  ;;  %v3118_v49 = vpop.eup %3117 }
0x12bf   :  { %3123 = vrcp.f32 %v1953_v17 }
0x12c4   :  { %v3120_v55 = vpop.eup %3119 }
0x12c5   :  { %v1932_v56 = vsel %vm3317_vm11, %v3118_v49, %v3120_v55  ;;  %v3122_v20 = vpop.eup %3121 }
0x12c6   :  { %1935 = vrot.lane.b32.xlu0 %v1932_v56, %s3161_s0  ;;  %v1933_v10 = vmul.f32 %v1932_v56, %v3693_v13  ;;  %v3157_v13 = vld [vmem:[%s3872_s5] sm:$0xff] }
0x12cc   :  { %v3124_v51 = vpop.eup %3123 }
0x12cd   :  { %v1957_v57 = vsel %vm3317_vm11, %v3122_v20, %v3124_v51 }
0x12ce   :  { %1960 = vrot.lane.b32.xlu1 %v1957_v57, %s3161_s0  ;;  %v1958_v22 = vmul.f32 %v1957_v57, %v3697_v34 }
0x1338   :  { %v1936_v61 = vpop.permute.xlu0 %1935 }
0x1339   :  { %v1938_v7 = vmul.f32 %v1936_v61, %v1932_v56 }
0x133b   :  { %1940 = vrot.lane.b32.xlu0 %v1938_v7, %s3162_s13 }
0x1340   :  { %v1961_v8 = vpop.permute.xlu1 %1960 }
0x1341   :  { %v1963_v9 = vmul.f32 %v1961_v8, %v1957_v57 }
0x1343   :  { %1965 = vrot.lane.b32.xlu1 %v1963_v9, %s3162_s13 }
0x13ad   :  { %v1941_v11 = vpop.permute.xlu0 %1940 }
0x13ae   :  { %v3754_v21 = vadd.f32 %v1941_v11, %v1933_v10 }
0x13b0   :  { %3125 = vtanh.f32 %v3754_v21 }
0x13b5   :  { %v1966_v41 = vpop.permute.xlu1 %1965 }
0x13b6   :  { %v3758_v14 = vadd.f32 %v1966_v41, %v1958_v22 }
0x13b8   :  { %3127 = vtanh.f32 %v3758_v14 }
0x13bd   :  { %v3126_v23 = vpop.eup %3125 }
0x13be   :  { %1946 = vrot.lane.b32.xlu0 %v3126_v23, %s3161_s0 }
0x13c5   :  { %v3128_v24 = vpop.eup %3127 }
0x13c6   :  { %1971 = vrot.lane.b32.xlu1 %v3128_v24, %s3161_s0 }
0x1430   :  { %v1947_v25 = vpop.permute.xlu0 %1946 }
0x1431   :  { %v1949_v26 = vmul.f32 %v1947_v25, %v1932_v56 }
0x1433   :  { %1976 = vrot.lane.b32.xlu0 %v1949_v26, %s3162_s13 }
0x1438   :  { %v1972_v15 = vpop.permute.xlu1 %1971 }
0x1439   :  { %v1974_v27 = vmul.f32 %v1972_v15, %v1957_v57 }
0x143b   :  { %2122 = vrot.lane.b32.xlu1 %v1974_v27, %s3162_s13 }
0x14a5   :  { %v1977_v28 = vpop.permute.xlu0 %1976 }
0x14a6   :  { %2972 = vmatmul.mubr.msk.f32.vlgmr.msra.gmra.mxu0 %vm242_vm8, %v1977_v28  ;;  %2983 = vmatmul.mubr.msk.f32.vlgmr.msra.gmra.mxu1 %vm242_vm8, %v1977_v28 }
0x14a7   :  { %2986 = vmatpush3.msra.mxu0 %v3463_v58  ;;  %2993 = vmatprep.mubr.msk.f32.mxu0 %vm3163_vm13, %v3160_v18 }
0x14a8   :  { %2987 = vmatprep.subr.mxu0 %v3160_v18  ;;  %2997 = vmatpush3.msra.mxu1 %v3154_v29 }
0x14a9   :  { %2988 = vmatpush3.msra.mxu0 %v3470_v0  ;;  %2998 = vmatprep.subr.mxu1 %v3160_v18 }
0x14aa   :  { %2989 = vmatprep.subr.mxu0 %v3160_v18  ;;  %2999 = vmatpush3.msra.mxu1 %v3155_v12  ;;  %v2430_v12 = vld [vmem:[%s3875_s8 + $0x38] sm:$0xff] }
0x14ab   :  { %2990 = vmatpush3.msra.mxu0 %v3479_v2  ;;  %3000 = vmatprep.subr.mxu1 %v3160_v18 }
0x14ac   :  { %2991 = vmatprep.subr.mxu0 %v3160_v18  ;;  %3001 = vmatpush3.msra.mxu1 %v3156_v30  ;;  %v2429_v30 = vld [vmem:[%s3875_s8 + $0x30] sm:$0xff] }
0x14ad   :  { %2992 = vmatpush3.msra.mxu0 %v3488_v5  ;;  %v2123_v31 = vpop.permute.xlu1 %2122  ;;  %3002 = vmatprep.subr.mxu1 %v3160_v18 }
0x14ae   :  { %2994 = vmatmul.mubr.msk.f32.vlgmr.msra.gmra.mxu0 %vm242_vm8, %v2123_v31  ;;  %3003 = vmatpush3.msra.mxu1 %v3157_v13  ;;  %v2427_v31 = vld [vmem:[%s3875_s8 + $0x20] sm:$0xff]  ;;  %v2426_v13 = vld [vmem:[%s3875_s8 + $0x18] sm:$0xff] }
0x14af   :  { %3004 = vmatprep.mubr.msk.f32.mxu1 %vm3163_vm13, %v3160_v18  ;;  %3007 = vmatprep.subr.mxu0 %v3160_v18 }
0x14b0   :  { %3008 = vmatpush3.msra.mxu0 %v3463_v58  ;;  %3015 = vmatprep.mubr.msk.f32.mxu0 %vm3163_vm13, %v3160_v18 }
0x14b1   :  { %3009 = vmatprep.subr.mxu0 %v3160_v18  ;;  %2472 = vmatprep.subr.mxu1 %v2430_v12 }
0x14b2   :  { %3010 = vmatpush3.msra.mxu0 %v3470_v0  ;;  %v3158_v0 = vld [vmem:[%s3873_s7] ss:$0 sm:$0xff] }
0x14b3   :  { %3011 = vmatprep.subr.mxu0 %v3160_v18 }
0x14b4   :  { %3012 = vmatpush3.msra.mxu0 %v3479_v2 }
0x14b5   :  { %3013 = vmatprep.subr.mxu0 %v3160_v18 }
0x14b6   :  { %3014 = vmatpush3.msra.mxu0 %v3488_v5 }
0x1566   :  { %v2046_v33 = vpop.f32.mrf.mxu0  ;;  %v2117_v58 = vpop.f32.mrf.mxu1 }
0x1567   :  { %v2050_v34 = vadd.f32 %v2046_v33, %v369_v32  ;;  %v2118_v37 = vadd.f32 %v3158_v0, %v2117_v58  ;;  %v2425_v32 = vld [vmem:[%s3875_s8 + $0x10] sm:$0xff]  ;;  %v2424_v33 = vld [vmem:[%s3875_s8 + $0x8] sm:$0xff]  ;;  %v2423_v58 = vld [vmem:[%s3875_s8] sm:$0xff] }
0x1568   :  { %v2973_v35 = vpop.f32.mrf.mxu0  ;;  %v2984_v36 = vpop.f32.mrf.mxu1 }
0x1569   :  { %v2584_v38 = vmul.f32 -1.442695, %v2050_v34 }
0x156b   :  { %3129 = vpow2.f32 %v2584_v38 }
0x156e   :  { %v2192_v2 = vpop.f32.mrf.mxu0 }
0x156f   :  { %v2196_v39 = vadd.f32 %v2192_v2, %v2118_v37  ;;  %v2431_v2 = vld [vmem:[%s3876_s9] sm:$0x3] }
0x1570   :  { %v2995_v43 = vpop.f32.mrf.mxu0 }
0x1571   :  { %v2585_v40 = vmul.f32 -1.442695, %v2196_v39 }
0x1573   :  { %3131 = vpow2.f32 %v2585_v40 }
0x1574   :  { %3133 = vtanh.f32 %v2050_v34 }
0x1578   :  { %v3130_v5 = vpop.eup %3129 }
0x1579   :  { %v2200_v44 = vadd.f32 1.0, %v3130_v5 }
0x157b   :  { %3135 = vrcp.f32 %v2200_v44 }
0x157c   :  { %3137 = vtanh.f32 %v2196_v39 }
0x1580   :  { %v3132_v16 = vpop.eup %3131 }
0x1581   :  { %v2225_v59 = vadd.f32 1.0, %v3132_v16  ;;  %v3134_v60 = vpop.eup %3133 }
0x1583   :  { %3139 = vrcp.f32 %v2225_v59 }
0x1588   :  { %v3136_v62 = vpop.eup %3135 }
0x1589   :  { %v2204_v63 = vsel %vm3317_vm11, %v3134_v60, %v3136_v62  ;;  %v3138_v1 = vpop.eup %3137 }
0x158a   :  { %2207 = vrot.lane.b32.xlu0 %v2204_v63, %s3161_s0  ;;  %v2205_v53 = vmul.f32 %v2204_v63, %v3754_v21 }
0x1590   :  { %v3140_v3 = vpop.eup %3139 }
0x1591   :  { %v2229_v48 = vsel %vm3317_vm11, %v3138_v1, %v3140_v3 }
0x1592   :  { %2232 = vrot.lane.b32.xlu1 %v2229_v48, %s3161_s0  ;;  %v2230_v54 = vmul.f32 %v2229_v48, %v3758_v14 }
0x15fc   :  { %v2208_v4 = vpop.permute.xlu0 %2207 }
0x15fd   :  { %v2210_v42 = vmul.f32 %v2208_v4, %v2204_v63 }
0x15ff   :  { %2212 = vrot.lane.b32.xlu0 %v2210_v42, %s3162_s13 }
0x1604   :  { %v2233_v6 = vpop.permute.xlu1 %2232 }
0x1605   :  { %v2235_v52 = vmul.f32 %v2233_v6, %v2229_v48 }
0x1607   :  { %2237 = vrot.lane.b32.xlu1 %v2235_v52, %s3162_s13 }
0x1671   :  { %v2213_v46 = vpop.permute.xlu0 %2212 }
0x1672   :  { %v2215_v45 = vadd.f32 %v2213_v46, %v2205_v53 }
0x1674   :  { %3141 = vtanh.f32 %v2215_v45 }
0x1679   :  { %v2238_v50 = vpop.permute.xlu1 %2237 }
0x167a   :  { %v2240_v17 = vadd.f32 %v2238_v50, %v2230_v54 }
0x167c   :  { %3143 = vtanh.f32 %v2240_v17 }
0x1681   :  { %v3142_v49 = vpop.eup %3141 }
0x1682   :  { %2218 = vrot.lane.b32.xlu0 %v3142_v49, %s3161_s0 }
0x1689   :  { %v3144_v55 = vpop.eup %3143 }
0x168a   :  { %2243 = vrot.lane.b32.xlu1 %v3144_v55, %s3161_s0 }
0x16f4   :  { %v2219_v56 = vpop.permute.xlu0 %2218 }
0x16f5   :  { %v2221_v20 = vmul.f32 %v2219_v56, %v2204_v63 }
0x16f7   :  { %2248 = vrot.lane.b32.xlu0 %v2221_v20, %s3162_s13 }
0x16fc   :  { %v2244_v51 = vpop.permute.xlu1 %2243 }
0x16fd   :  { %v2246_v57 = vmul.f32 %v2244_v51, %v2229_v48 }
0x16ff   :  { %2323 = vrot.lane.b32.xlu1 %v2246_v57, %s3162_s13 }
0x1769   :  { %v2249_v61 = vpop.permute.xlu0 %2248 }
0x176a   :  { %3005 = vmatmul.mubr.msk.f32.vlgmr.msra.gmra.mxu1 %vm242_vm8, %v2249_v61 }
0x176b   :  { %2512 = vmatprep.mubr.f32.mxu1 %v3160_v18  ;;  %2473 = vmatpush1.msra.mxu1 %v2429_v30 }
0x176c   :  { %2474 = vmatprep.subr.mxu1 %v2428_v47 }
0x176d   :  { %2475 = vmatpush1.msra.mxu1 %v2427_v31 }
0x176e   :  { %2476 = vmatprep.subr.mxu1 %v2426_v13 }
0x176f   :  { %2477 = vmatpush1.msra.mxu1 %v2425_v32 }
0x1770   :  { %2478 = vmatprep.subr.mxu1 %v2424_v33 }
0x1771   :  { %v2324_v7 = vpop.permute.xlu1 %2323  ;;  %2479 = vmatpush1.msra.mxu1 %v2423_v58 }
0x1772   :  { %3016 = vmatmul.mubr.msk.f32.vlgmr.msra.gmra.mxu0 %vm242_vm8, %v2324_v7 }
0x182a   :  { %v2318_v8 = vpop.f32.mrf.mxu1 }
0x182b   :  { %v2319_v10 = vadd.f32 %v3158_v0, %v2318_v8  ;;  %v2434_v0 = vshrl.u32 %v43_v19, 7 }
0x182c   :  { %v3006_v9 = vpop.f32.mrf.mxu1 }
0x182d   :  { %v2435_v37 = vsub.s32 0, %v2434_v0  ;;  %v2439_v39 = vsub.s32 1, %v2434_v0 }
0x182f   :  { %v2436_v43 = vrot.slane %v2431_v2, %v2435_v37  ;;  %v2440_v40 = vrot.slane %v2431_v2, %v2439_v39 }
0x1832   :  { %v2393_v11 = vpop.f32.mrf.mxu0 }
0x1833   :  { %v2397_v21 = vadd.f32 %v2393_v11, %v2319_v10 }
0x1834   :  { %v3017_v22 = vpop.f32.mrf.mxu0 }
0x1835   :  { %v2588_v41 = vmul.f32 -1.442695, %v2397_v21 }
0x1837   :  { %3145 = vpow2.f32 %v2588_v41 }
0x1838   :  { %3147 = vtanh.f32 %v2397_v21 }
0x1844   :  { %v3146_v14 = vpop.eup %3145 }
0x1845   :  { %v2401_v23 = vadd.f32 1.0, %v3146_v14  ;;  %v3148_v24 = vpop.eup %3147 }
0x1847   :  { %3149 = vrcp.f32 %v2401_v23 }
0x1854   :  { %v3150_v25 = vpop.eup %3149 }
0x1855   :  { %v2405_v18 = vsel %vm3317_vm11, %v3148_v24, %v3150_v25 }
0x1856   :  { %2408 = vrot.lane.b32.xlu0 %v2405_v18, %s3161_s0  ;;  %v2406_v27 = vmul.f32 %v2405_v18, %v2240_v17 }
0x18c8   :  { %v2409_v26 = vpop.permute.xlu0 %2408 }
0x18c9   :  { %v2411_v15 = vmul.f32 %v2409_v26, %v2405_v18 }
0x18cb   :  { %2413 = vrot.lane.b32.xlu1 %v2411_v15, %s3162_s13 }
0x193d   :  { %v2414_v28 = vpop.permute.xlu1 %2413 }
0x193e   :  { %v2416_v29 = vadd.f32 %v2414_v28, %v2406_v27 }
0x1940   :  { %3151 = vtanh.f32 %v2416_v29 }
0x194d   :  { %v3152_v34 = vpop.eup %3151 }
0x194e   :  { %2419 = vrot.lane.b32.xlu0 %v3152_v34, %s3161_s0 }
0x19c0   :  { %v2420_v35 = vpop.permute.xlu0 %2419 }
0x19c1   :  { %v2422_v36 = vmul.f32 %v2420_v35, %v2405_v18 }
0x19c3   :  { %2444 = vrot.lane.b32.xlu1 %v2422_v36, %s3162_s13 }
0x1a35   :  { %v2445_v38 = vpop.permute.xlu1 %2444 }
0x1a36   :  { %2589 = vmatmul.mubr.msk.f32.vlgmr.msra.gmra.mxu1 %vm242_vm8, %v2445_v38 }
0x1af6   :  { %v2514_v5 = vpop.f32.mrf.mxu1 }
0x1af7   :  { %v2515_v44 = vadd.f32 %v2514_v5, %v2436_v43 }
0x1af8   :  { %v2516_v16 = vpop.f32.mrf.mxu1 }
0x1af9   :  { %2519 = vst [vmem:[%s3877_s10] sm:$0xff] %v2515_v44  ;;  %v2517_v59 = vadd.f32 %v2516_v16, %v2440_v40 }
0x1afb   :  { %2520 = vst [vmem:[%s3877_s10 + $0x8] sm:$0xff] %v2517_v59 }

</bundles_post_ra>
